<compile_context>
chip_gen: v7x
topology: tpu7x:2x2x1
jax: 0.10.0
libtpu: 0.0.40
codegen_flags: <defaults>
</compile_context>

<pallas_src>
import functools

import jax
import jax.numpy as jnp
from jax.experimental import pallas as pl
from jax.experimental.pallas import tpu as pltpu


def _vmem_limit_bytes():
    """Generation-aware scoped-VMEM cap: ~3/4 of physical per-core VMEM.

    v5e/v6e (128 MiB physical) -> 96 MiB; v7x (64 MiB physical) -> 48 MiB.
    Falls back to 48 MiB (safe on every generation) if the query fails.
    """
    phys = 64 << 20
    try:
        phys = int(getattr(pltpu.get_tpu_info(), "vmem_capacity_bytes", phys))
    except Exception:
        pass
    return max(32 << 20, min(phys * 3 // 4, 100 << 20))


def _pick_row_tile(H, W, C_out, N):
    """Phase-1 row tile TH: divides H, TH*W % 128 == 0 (lane-dense stores),
    ~<= 8 MiB per output block, and >= ~4 grid steps for v7x 2-TC load balance."""
    cands = [d for d in range(1, H + 1) if H % d == 0 and (d * W) % 128 == 0]
    if not cands:
        return H                      # single tile: block last dim == H*W (full dim)
    budget_rows = max(1, (8 << 20) // max(1, 4 * W * C_out))
    balance_rows = max(1, (N * H) // 4)
    cap = min(budget_rows, balance_rows)
    ok = [d for d in cands if d <= cap]
    return max(ok) if ok else min(cands)


def _pick_apply_tile(rows, row_bytes):
    """Phase-2 row tile over (N*C_out, H*W): divides rows, %8 (or full), ~<=16 MiB."""
    cands = [d for d in range(1, rows + 1)
             if rows % d == 0 and (d % 8 == 0 or d == rows)]
    budget = max(1, (16 << 20) // max(1, row_bytes))
    ok = [d for d in cands if d <= budget]
    return max(ok) if ok else min(cands)


def _conv_stats_kernel(x_ref, wt_ref, y_ref, sum_ref, sq_ref, *, TH, W, C_in, C_out):
    # x_ref:   (H+2, W+2, C_in)   padded NHWC image (VMEM-resident across row tiles).
    # wt_ref:  (C_out, 9*C_in)    conv weights, transposed im2col layout.
    # y_ref:   (C_out, TH*W)      conv output tile -- lane-dense NCHW slab.
    # sum_ref: (C_out, 1)         per-image running sum       (accumulated over t).
    # sq_ref:  (C_out, 1)         per-image running sum of sq (accumulated over t).
    t = pl.program_id(1)
    row0 = t * TH
    if TH % 8 == 0:
        row0 = pl.multiple_of(row0, 8)

    # Single im2col patch -> one MXU push with K = 9*C_in (instead of 9 K=C_in dots).
    cols = []
    for kh in range(3):
        rows = x_ref[pl.ds(row0 + kh, TH), :, :]            # (TH, W+2, C_in)
        for kw in range(3):
            cols.append(rows[:, kw:kw + W, :].reshape(TH * W, C_in))
    patch = jnp.concatenate(cols, axis=-1)                  # (TH*W, 9*C_in)

    # (C_out, 9*C_in) x (TH*W, 9*C_in)^T -> (C_out, TH*W): result is already the
    # lane-dense NCHW slab, so no output relayout/transpose is needed before the store.
    out_t = jax.lax.dot_general(
        wt_ref[...], patch,
        dimension_numbers=(((1,), (1,)), ((), ())),
        preferred_element_type=jnp.float32)
    y_ref[...] = out_t

    # BN partial statistics, accumulated in output-resident blocks across t.
    @pl.when(t == 0)
    def _():
        sum_ref[...] = jnp.zeros_like(sum_ref)
        sq_ref[...] = jnp.zeros_like(sq_ref)

    sum_ref[...] += jnp.sum(out_t, axis=1, keepdims=True)
    sq_ref[...] += jnp.sum(out_t * out_t, axis=1, keepdims=True)


def _bn_relu_kernel(y_ref, scale_ref, shift_ref, o_ref):
    # Lane-dense epilogue on the (N*C_out, H*W) view; scale/shift are per-row (channel).
    o_ref[...] = jnp.maximum(y_ref[...] * scale_ref[...] + shift_ref[...], 0.0)


def single_conv_block(x_nchw, w_oihw, bias, gamma, beta, eps=1e-5,
                      row_tile=None, apply_row_tile=None):
    """Forward pass of SingleConvBlock. x_nchw: (N, C_in, H, W) float32, returns NCHW."""
    del bias  # cancels exactly under training-mode BN (batch-mean subtraction)
    N, C_in, H, W = x_nchw.shape
    C_out = w_oihw.shape[0]
    vmem_cap = _vmem_limit_bytes()

    # ---- layout staging (plain JAX; single fused pass over x) ----------------------
    x_nhwc = jnp.transpose(x_nchw, (0, 2, 3, 1)).astype(jnp.float32)
    x_pad = jnp.pad(x_nhwc, ((0, 0), (1, 1), (1, 1), (0, 0)))
    # im2col weight layout: K rows ordered (kh, kw, ci); transposed for the kernel.
    w_mat_t = jnp.transpose(
        jnp.transpose(w_oihw, (2, 3, 1, 0)).astype(jnp.float32).reshape(9 * C_in, C_out))

    # ---- phase-1 tiling --------------------------------------------------------------
    if row_tile is None:
        row_tile = _pick_row_tile(H, W, C_out, N)
    TH = int(row_tile)
    if H % TH != 0:
        raise ValueError(f"row_tile={TH} must divide H={H}")
    if (TH * W) % 128 != 0 and TH != H:
        raise ValueError(f"row_tile={TH}: TH*W must be a multiple of 128 (or TH == H)")
    n_t = H // TH

    kernel1 = functools.partial(_conv_stats_kernel, TH=TH, W=W, C_in=C_in, C_out=C_out)
    y_conv, sum_p, sq_p = pl.pallas_call(
        kernel1,
        grid=(N, n_t),
        out_shape=(
            jax.ShapeDtypeStruct((N, C_out, H * W), jnp.float32),  # NCHW, HW flattened
            jax.ShapeDtypeStruct((N, C_out, 1), jnp.float32),
            jax.ShapeDtypeStruct((N, C_out, 1), jnp.float32),
        ),
        in_specs=[
            # Whole padded image of batch n; index ignores t -> fetched once, resident
            # across the row-tile axis (no wrapper-side halo duplication).
            pl.BlockSpec((None, H + 2, W + 2, C_in), lambda n, t: (n, 0, 0, 0)),
            pl.BlockSpec((C_out, 9 * C_in), lambda n, t: (0, 0)),
        ],
        out_specs=(
            pl.BlockSpec((None, C_out, TH * W), lambda n, t: (n, 0, t)),
            pl.BlockSpec((None, C_out, 1), lambda n, t: (n, 0, 0)),   # accumulated over t
            pl.BlockSpec((None, C_out, 1), lambda n, t: (n, 0, 0)),   # accumulated over t
        ),
        compiler_params=pltpu.CompilerParams(
            dimension_semantics=("parallel", "arbitrary"),
            vmem_limit_bytes=vmem_cap),
    )(x_pad, w_mat_t)

    # ---- reduce BN statistics (tiny, wrapper-side) ----------------------------------
    count = float(N * H * W)
    sums = jnp.sum(sum_p, axis=0)[:, 0]                    # (C_out,)
    sqs = jnp.sum(sq_p, axis=0)[:, 0]                      # (C_out,)
    mean = sums / count
    var = jnp.maximum(sqs / count - mean * mean, 0.0)      # biased var (BN training)
    scale_c = gamma.astype(jnp.float32) * jax.lax.rsqrt(var + eps)
    shift_c = beta.astype(jnp.float32) - mean * scale_c
    scale_col = jnp.tile(scale_c, N).reshape(N * C_out, 1)  # row index = n*C_out + c
    shift_col = jnp.tile(shift_c, N).reshape(N * C_out, 1)

    # ---- phase 2: lane-dense BN apply + ReLU, in place -------------------------------
    rows = N * C_out
    hw = H * W
    y2 = y_conv.reshape(rows, hw)                          # free: contiguous NCHW view
    if apply_row_tile is None:
        apply_row_tile = _pick_apply_tile(rows, 4 * hw)
    TM = int(apply_row_tile)
    if rows % TM != 0:
        raise ValueError(f"apply_row_tile={TM} must divide N*C_out={rows}")

    out2 = pl.pallas_call(
        _bn_relu_kernel,
        grid=(rows // TM,),
        out_shape=jax.ShapeDtypeStruct((rows, hw), jnp.float32),
        in_specs=[
            pl.BlockSpec((TM, hw), lambda i: (i, 0)),
            pl.BlockSpec((TM, 1), lambda i: (i, 0)),
            pl.BlockSpec((TM, 1), lambda i: (i, 0)),
        ],
        out_specs=pl.BlockSpec((TM, hw), lambda i: (i, 0)),
        input_output_aliases={0: 0},                       # run BN+ReLU in place on y
        compiler_params=pltpu.CompilerParams(
            dimension_semantics=("parallel",),
            vmem_limit_bytes=vmem_cap),
    )(y2, scale_col, shift_col)

    return out2.reshape(N, C_out, H, W)                    # already NCHW: no transpose


def _reference(x_nchw, w_oihw, bias, gamma, beta, eps=1e-5):
    """Pure-JAX reference (conv+bias + training-mode BN + ReLU) for validation."""
    y = jax.lax.conv_general_dilated(
        x_nchw, w_oihw, window_strides=(1, 1), padding=((1, 1), (1, 1)),
        dimension_numbers=("NCHW", "OIHW", "NCHW"))
    y = y + bias.reshape(1, -1, 1, 1)
    mean = jnp.mean(y, axis=(0, 2, 3), keepdims=True)
    var = jnp.mean((y - mean) ** 2, axis=(0, 2, 3), keepdims=True)
    y = (y - mean) * jax.lax.rsqrt(var + eps)
    y = y * gamma.reshape(1, -1, 1, 1) + beta.reshape(1, -1, 1, 1)
    return jnp.maximum(y, 0.0)


if __name__ == "__main__":
    N, C_in, C_out, H, W = 2, 4, 8, 16, 16

    key = jax.random.PRNGKey(0)
    kx, kw, kb = jax.random.split(key, 3)
    x = jax.random.normal(kx, (N, C_in, H, W), jnp.float32)
    # nn.Conv2d(ch_in, ch_out, 3) default-init-style params; BN gamma=1, beta=0.
    fan_in = C_in * 3 * 3
    bound = 1.0 / (fan_in ** 0.5)
    w = jax.random.uniform(kw, (C_out, C_in, 3, 3), jnp.float32, -bound, bound)
    b = jax.random.uniform(kb, (C_out,), jnp.float32, -bound, bound)
    gamma = jnp.ones((C_out,), jnp.float32)
    beta = jnp.zeros((C_out,), jnp.float32)

    fwd = jax.jit(single_conv_block,
                  static_argnames=("eps", "row_tile", "apply_row_tile"))
    # Auto tiling picks TH=8 here -> grid (N=2, n_t=2): exercises the in-kernel halo
    # row slicing and the cross-tile BN-stats accumulation path.
    out = jax.block_until_ready(fwd(x, w, b, gamma, beta))

    ref = _reference(x, w, b, gamma, beta)
    assert out.shape == (N, C_out, H, W)
    # Tolerance covers reassociated f32 reductions (im2col dot, tile partials,
    # E[y^2]-mean^2 batch variance) vs the reference's direct reductions.
    assert jnp.allclose(out, ref, atol=1e-3, rtol=1e-3), "mismatch vs reference"

    print("KERNEL_OK")
</pallas_src>

<mosaic_0001>
module attributes {stable_mosaic.version = 11 : i64} {
  func.func @_bn_relu_kernel(%arg0: i32, %arg1: memref<16x256xf32, #tpu.memory_space<vmem>>, %arg2: memref<16x1xf32, #tpu.memory_space<vmem>>, %arg3: memref<16x1xf32, #tpu.memory_space<vmem>>, %arg4: memref<16x256xf32, #tpu.memory_space<vmem>>) attributes {dimension_semantics = [#tpu.dimension_semantics<parallel>], iteration_bounds = array<i64: 1>, scalar_prefetch = 0 : i64, scratch_operands = 0 : i64, tpu.core_type = #tpu.core_type<tc>, window_params = [{transform_indices = @transform_0, window_bounds = array<i64: 16, 256>}, {transform_indices = @transform_1, window_bounds = array<i64: 16, 1>}, {transform_indices = @transform_2, window_bounds = array<i64: 16, 1>}, {transform_indices = @transform_3, window_bounds = array<i64: 16, 256>}]} {
    %c0 = arith.constant 0 : index
    %c0_0 = arith.constant 0 : index
    %0 = vector.load %arg1[%c0, %c0_0] : memref<16x256xf32, #tpu.memory_space<vmem>>, vector<16x256xf32>
    %c0_1 = arith.constant 0 : index
    %c0_2 = arith.constant 0 : index
    %1 = vector.load %arg2[%c0_1, %c0_2] : memref<16x1xf32, #tpu.memory_space<vmem>>, vector<16x1xf32>
    %2 = vector.broadcast %1 : vector<16x1xf32> to vector<16x256xf32>
    %3 = arith.mulf %0, %2 : vector<16x256xf32>
    %c0_3 = arith.constant 0 : index
    %c0_4 = arith.constant 0 : index
    %4 = vector.load %arg3[%c0_3, %c0_4] : memref<16x1xf32, #tpu.memory_space<vmem>>, vector<16x1xf32>
    %5 = vector.broadcast %4 : vector<16x1xf32> to vector<16x256xf32>
    %6 = arith.addf %3, %5 : vector<16x256xf32>
    %cst = arith.constant 0.000000e+00 : f32
    %7 = vector.broadcast %cst : f32 to vector<16x256xf32>
    %8 = arith.maximumf %6, %7 : vector<16x256xf32>
    %c0_5 = arith.constant 0 : index
    %c0_6 = arith.constant 0 : index
    %9 = vector.load %arg4[%c0_5, %c0_6] : memref<16x256xf32, #tpu.memory_space<vmem>>, vector<16x256xf32>
    tpu.vector_store %arg4[%c0_5, %c0_6], %8 {strides = array<i32>} : memref<16x256xf32, #tpu.memory_space<vmem>>, vector<16x256xf32>,
    return
  }
  func.func @transform_0(%arg0: i32) -> (i32, i32) {
    %c0_i32 = arith.constant 0 : i32
    %c0_i32_0 = arith.constant 0 : i32
    return %arg0, %c0_i32 : i32, i32
  }
  func.func @transform_1(%arg0: i32) -> (i32, i32) {
    %c0_i32 = arith.constant 0 : i32
    %c0_i32_0 = arith.constant 0 : i32
    return %arg0, %c0_i32 : i32, i32
  }
  func.func @transform_2(%arg0: i32) -> (i32, i32) {
    %c0_i32 = arith.constant 0 : i32
    %c0_i32_0 = arith.constant 0 : i32
    return %arg0, %c0_i32 : i32, i32
  }
  func.func @transform_3(%arg0: i32) -> (i32, i32) {
    %c0_i32 = arith.constant 0 : i32
    %c0_i32_0 = arith.constant 0 : i32
    return %arg0, %c0_i32 : i32, i32
  }
}

module attributes {stable_mosaic.version = 11 : i64} {
  func.func @_conv_stats_kernel(%arg0: i32, %arg1: i32, %arg2: memref<1x18x18x4xf32, #tpu.memory_space<vmem>>, %arg3: memref<8x36xf32, #tpu.memory_space<vmem>>, %arg4: memref<1x8x128xf32, #tpu.memory_space<vmem>>, %arg5: memref<1x8x1xf32, #tpu.memory_space<vmem>>, %arg6: memref<1x8x1xf32, #tpu.memory_space<vmem>>) attributes {dimension_semantics = [#tpu.dimension_semantics<parallel>, #tpu.dimension_semantics<arbitrary>], iteration_bounds = array<i64: 2, 2>, scalar_prefetch = 0 : i64, scratch_operands = 0 : i64, tpu.core_type = #tpu.core_type<tc>, window_params = [{transform_indices = @transform_0, window_bounds = array<i64: 1, 18, 18, 4>}, {pipeline_mode = #tpu.pipeline_mode<synchronous>, transform_indices = @transform_1, window_bounds = array<i64: 8, 36>}, {transform_indices = @transform_2, window_bounds = array<i64: 1, 8, 128>}, {transform_indices = @transform_3, window_bounds = array<i64: 1, 8, 1>}, {transform_indices = @transform_4, window_bounds = array<i64: 1, 8, 1>}]} {
    %c8_i32 = arith.constant 8 : i32
    %0 = arith.muli %arg1, %c8_i32 : i32
    %1 = tpu.assume_multiple %0, 8 : i32
    %c0_i32 = arith.constant 0 : i32
    %2 = arith.addi %1, %c0_i32 : i32
    %c0 = arith.constant 0 : index
    %3 = arith.index_cast %2 : i32 to index
    %c0_0 = arith.constant 0 : index
    %c0_1 = arith.constant 0 : index
    %4 = vector.load %arg2[%c0, %3, %c0_0, %c0_1] : memref<1x18x18x4xf32, #tpu.memory_space<vmem>>, vector<1x8x18x4xf32>
    %5 = vector.shape_cast %4 : vector<1x8x18x4xf32> to vector<8x18x4xf32>
    %6 = vector.extract_strided_slice %5 {offsets = [0, 0, 0], sizes = [8, 16, 4], strides = [1, 1, 1]} : vector<8x18x4xf32> to vector<8x16x4xf32>
    %7 = vector.shape_cast %6 : vector<8x16x4xf32> to vector<128x4xf32>
    %8 = vector.extract_strided_slice %5 {offsets = [0, 1, 0], sizes = [8, 16, 4], strides = [1, 1, 1]} : vector<8x18x4xf32> to vector<8x16x4xf32>
    %9 = vector.shape_cast %8 : vector<8x16x4xf32> to vector<128x4xf32>
    %10 = vector.extract_strided_slice %5 {offsets = [0, 2, 0], sizes = [8, 16, 4], strides = [1, 1, 1]} : vector<8x18x4xf32> to vector<8x16x4xf32>
    %11 = vector.shape_cast %10 : vector<8x16x4xf32> to vector<128x4xf32>
    %c1_i32 = arith.constant 1 : i32
    %12 = arith.addi %1, %c1_i32 : i32
    %c0_2 = arith.constant 0 : index
    %13 = arith.index_cast %12 : i32 to index
    %c0_3 = arith.constant 0 : index
    %c0_4 = arith.constant 0 : index
    %14 = vector.load %arg2[%c0_2, %13, %c0_3, %c0_4] : memref<1x18x18x4xf32, #tpu.memory_space<vmem>>, vector<1x8x18x4xf32>
    %15 = vector.shape_cast %14 : vector<1x8x18x4xf32> to vector<8x18x4xf32>
    %16 = vector.extract_strided_slice %15 {offsets = [0, 0, 0], sizes = [8, 16, 4], strides = [1, 1, 1]} : vector<8x18x4xf32> to vector<8x16x4xf32>
    %17 = vector.shape_cast %16 : vector<8x16x4xf32> to vector<128x4xf32>
    %18 = vector.extract_strided_slice %15 {offsets = [0, 1, 0], sizes = [8, 16, 4], strides = [1, 1, 1]} : vector<8x18x4xf32> to vector<8x16x4xf32>
    %19 = vector.shape_cast %18 : vector<8x16x4xf32> to vector<128x4xf32>
    %20 = vector.extract_strided_slice %15 {offsets = [0, 2, 0], sizes = [8, 16, 4], strides = [1, 1, 1]} : vector<8x18x4xf32> to vector<8x16x4xf32>
    %21 = vector.shape_cast %20 : vector<8x16x4xf32> to vector<128x4xf32>
    %c2_i32 = arith.constant 2 : i32
    %22 = arith.addi %1, %c2_i32 : i32
    %c0_5 = arith.constant 0 : index
    %23 = arith.index_cast %22 : i32 to index
    %c0_6 = arith.constant 0 : index
    %c0_7 = arith.constant 0 : index
    %24 = vector.load %arg2[%c0_5, %23, %c0_6, %c0_7] : memref<1x18x18x4xf32, #tpu.memory_space<vmem>>, vector<1x8x18x4xf32>
    %25 = vector.shape_cast %24 : vector<1x8x18x4xf32> to vector<8x18x4xf32>
    %26 = vector.extract_strided_slice %25 {offsets = [0, 0, 0], sizes = [8, 16, 4], strides = [1, 1, 1]} : vector<8x18x4xf32> to vector<8x16x4xf32>
    %27 = vector.shape_cast %26 : vector<8x16x4xf32> to vector<128x4xf32>
    %28 = vector.extract_strided_slice %25 {offsets = [0, 1, 0], sizes = [8, 16, 4], strides = [1, 1, 1]} : vector<8x18x4xf32> to vector<8x16x4xf32>
    %29 = vector.shape_cast %28 : vector<8x16x4xf32> to vector<128x4xf32>
    %30 = vector.extract_strided_slice %25 {offsets = [0, 2, 0], sizes = [8, 16, 4], strides = [1, 1, 1]} : vector<8x18x4xf32> to vector<8x16x4xf32>
    %31 = vector.shape_cast %30 : vector<8x16x4xf32> to vector<128x4xf32>
    %32 = tpu.concatenate %7, %9, %11, %17, %19, %21, %27, %29, %31 in 1 : vector<128x4xf32>, vector<128x4xf32>, vector<128x4xf32>, vector<128x4xf32>, vector<128x4xf32>, vector<128x4xf32>, vector<128x4xf32>, vector<128x4xf32>, vector<128x4xf32> -> vector<128x36xf32>
    %c0_8 = arith.constant 0 : index
    %c0_9 = arith.constant 0 : index
    %33 = vector.load %arg3[%c0_8, %c0_9] : memref<8x36xf32, #tpu.memory_space<vmem>>, vector<8x36xf32>
    %cst = arith.constant dense<0.000000e+00> : vector<8x128xf32>
    %34 = tpu.matmul %33, %32, %cst {dimension_numbers = #tpu.dot_dimension_numbers<[1], [1], [0], [0], [0, 0, 1, 0], [], []>} : vector<8x36xf32>, vector<128x36xf32>, vector<8x128xf32> -> vector<8x128xf32>
    %c0_10 = arith.constant 0 : index
    %c0_11 = arith.constant 0 : index
    %c0_12 = arith.constant 0 : index
    %35 = vector.load %arg4[%c0_10, %c0_11, %c0_12] : memref<1x8x128xf32, #tpu.memory_space<vmem>>, vector<1x8x128xf32>
    %36 = vector.shape_cast %35 : vector<1x8x128xf32> to vector<8x128xf32>
    %37 = vector.shape_cast %34 : vector<8x128xf32> to vector<1x8x128xf32>
    tpu.vector_store %arg4[%c0_10, %c0_11, %c0_12], %37 {strides = array<i32>} : memref<1x8x128xf32, #tpu.memory_space<vmem>>, vector<1x8x128xf32>,
    %c0_i32_13 = arith.constant 0 : i32
    %38 = arith.cmpi eq, %arg1, %c0_i32_13 : i32
    %39 = arith.extui %38 : i1 to i32
    %c0_i32_14 = arith.constant 0 : i32
    %40 = arith.cmpi ne, %39, %c0_i32_14 : i32
    scf.if %40 {
      %cst_29 = arith.constant 0.000000e+00 : f32
      %58 = vector.broadcast %cst_29 : f32 to vector<8x1xf32>
      %c0_30 = arith.constant 0 : index
      %c0_31 = arith.constant 0 : index
      %c0_32 = arith.constant 0 : index
      %59 = vector.load %arg5[%c0_30, %c0_31, %c0_32] : memref<1x8x1xf32, #tpu.memory_space<vmem>>, vector<1x8x1xf32>
      %60 = vector.shape_cast %59 : vector<1x8x1xf32> to vector<8x1xf32>
      %61 = vector.shape_cast %58 : vector<8x1xf32> to vector<1x8x1xf32>
      tpu.vector_store %arg5[%c0_30, %c0_31, %c0_32], %61 {strides = array<i32>} : memref<1x8x1xf32, #tpu.memory_space<vmem>>, vector<1x8x1xf32>,
      %cst_33 = arith.constant 0.000000e+00 : f32
      %62 = vector.broadcast %cst_33 : f32 to vector<8x1xf32>
      %c0_34 = arith.constant 0 : index
      %c0_35 = arith.constant 0 : index
      %c0_36 = arith.constant 0 : index
      %63 = vector.load %arg6[%c0_34, %c0_35, %c0_36] : memref<1x8x1xf32, #tpu.memory_space<vmem>>, vector<1x8x1xf32>
      %64 = vector.shape_cast %63 : vector<1x8x1xf32> to vector<8x1xf32>
      %65 = vector.shape_cast %62 : vector<8x1xf32> to vector<1x8x1xf32>
      tpu.vector_store %arg6[%c0_34, %c0_35, %c0_36], %65 {strides = array<i32>} : memref<1x8x1xf32, #tpu.memory_space<vmem>>, vector<1x8x1xf32>,
    } else {
    }
    %c0_15 = arith.constant 0 : index
    %c0_16 = arith.constant 0 : index
    %c0_17 = arith.constant 0 : index
    %41 = vector.load %arg5[%c0_15, %c0_16, %c0_17] : memref<1x8x1xf32, #tpu.memory_space<vmem>>, vector<1x8x1xf32>
    %42 = vector.shape_cast %41 : vector<1x8x1xf32> to vector<8x1xf32>
    %cst_18 = arith.constant dense<0.000000e+00> : vector<8xf32>
    %43 = vector.multi_reduction <add>, %34, %cst_18 [1] : vector<8x128xf32> to vector<8xf32>
    %44 = vector.shape_cast %43 : vector<8xf32> to vector<8x1xf32>
    %45 = arith.addf %42, %44 : vector<8x1xf32>
    %c0_19 = arith.constant 0 : index
    %c0_20 = arith.constant 0 : index
    %c0_21 = arith.constant 0 : index
    %46 = vector.load %arg5[%c0_19, %c0_20, %c0_21] : memref<1x8x1xf32, #tpu.memory_space<vmem>>, vector<1x8x1xf32>
    %47 = vector.shape_cast %46 : vector<1x8x1xf32> to vector<8x1xf32>
    %48 = vector.shape_cast %45 : vector<8x1xf32> to vector<1x8x1xf32>
    tpu.vector_store %arg5[%c0_19, %c0_20, %c0_21], %48 {strides = array<i32>} : memref<1x8x1xf32, #tpu.memory_space<vmem>>, vector<1x8x1xf32>,
    %c0_22 = arith.constant 0 : index
    %c0_23 = arith.constant 0 : index
    %c0_24 = arith.constant 0 : index
    %49 = vector.load %arg6[%c0_22, %c0_23, %c0_24] : memref<1x8x1xf32, #tpu.memory_space<vmem>>, vector<1x8x1xf32>
    %50 = vector.shape_cast %49 : vector<1x8x1xf32> to vector<8x1xf32>
    %51 = arith.mulf %34, %34 : vector<8x128xf32>
    %cst_25 = arith.constant dense<0.000000e+00> : vector<8xf32>
    %52 = vector.multi_reduction <add>, %51, %cst_25 [1] : vector<8x128xf32> to vector<8xf32>
    %53 = vector.shape_cast %52 : vector<8xf32> to vector<8x1xf32>
    %54 = arith.addf %50, %53 : vector<8x1xf32>
    %c0_26 = arith.constant 0 : index
    %c0_27 = arith.constant 0 : index
    %c0_28 = arith.constant 0 : index
    %55 = vector.load %arg6[%c0_26, %c0_27, %c0_28] : memref<1x8x1xf32, #tpu.memory_space<vmem>>, vector<1x8x1xf32>
    %56 = vector.shape_cast %55 : vector<1x8x1xf32> to vector<8x1xf32>
    %57 = vector.shape_cast %54 : vector<8x1xf32> to vector<1x8x1xf32>
    tpu.vector_store %arg6[%c0_26, %c0_27, %c0_28], %57 {strides = array<i32>} : memref<1x8x1xf32, #tpu.memory_space<vmem>>, vector<1x8x1xf32>,
    return
  }
  func.func @transform_0(%arg0: i32, %arg1: i32) -> (i32, i32, i32, i32) {
    %c0_i32 = arith.constant 0 : i32
    %c0_i32_0 = arith.constant 0 : i32
    %c0_i32_1 = arith.constant 0 : i32
    %c0_i32_2 = arith.constant 0 : i32
    return %arg0, %c0_i32, %c0_i32_0, %c0_i32_1 : i32, i32, i32, i32
  }
  func.func @transform_1(%arg0: i32, %arg1: i32) -> (i32, i32) {
    %c0_i32 = arith.constant 0 : i32
    %c0_i32_0 = arith.constant 0 : i32
    %c0_i32_1 = arith.constant 0 : i32
    return %c0_i32, %c0_i32_0 : i32, i32
  }
  func.func @transform_2(%arg0: i32, %arg1: i32) -> (i32, i32, i32) {
    %c0_i32 = arith.constant 0 : i32
    %c0_i32_0 = arith.constant 0 : i32
    return %arg0, %c0_i32, %arg1 : i32, i32, i32
  }
  func.func @transform_3(%arg0: i32, %arg1: i32) -> (i32, i32, i32) {
    %c0_i32 = arith.constant 0 : i32
    %c0_i32_0 = arith.constant 0 : i32
    %c0_i32_1 = arith.constant 0 : i32
    return %arg0, %c0_i32, %c0_i32_0 : i32, i32, i32
  }
  func.func @transform_4(%arg0: i32, %arg1: i32) -> (i32, i32, i32) {
    %c0_i32 = arith.constant 0 : i32
    %c0_i32_0 = arith.constant 0 : i32
    %c0_i32_1 = arith.constant 0 : i32
    return %arg0, %c0_i32, %c0_i32_0 : i32, i32, i32
  }
}

</mosaic_0001>

<bundles_post_ra>
// kernel: tile.13
= control target key start
LH: loop header
LB: loop body
LE: loop exit
PB: predicated region body
PF: predicated region fallthrough
CT: control target
= control target key end

     0   :  { %s22_s0 = inlined_call_operand.vmem [shape: f32[8], index: 0, kind: input, shape index: {}]   ;;  %s23_s1 = inlined_call_operand.vmem [shape: f32[2,8], index: 1, kind: output, shape index: {}]  }
   0x1   :  { %v4_v0 = vld [vmem:[%s22_s0] ss:$0 sm:$0xff] }
   0x2   :  { %5 = vst [vmem:[%s23_s1] sm:$0x3] %v4_v0 }

// kernel: tile.0
= control target key start
LH: loop header
LB: loop body
LE: loop exit
PB: predicated region body
PF: predicated region fallthrough
CT: control target
= control target key end

     0   :  { %s66_s8 = smov 125   ;;  %vm7_vm0 = vcmask 7168   ;;  %s67_s11 = smov 126   ;;  %s117_s0 = inlined_call_operand.vmem [shape: f32[2,8], index: 0, kind: input, shape index: {}]   ;;  %s118_s1 = inlined_call_operand.vmem [shape: f32[16,1], index: 1, kind: output, shape index: {}]  }
   0x1   :  { %v4_v0 = vld [vmem:[%s117_s0] sm:$0x3]  ;;  %s65_s0 = smov 127   ;;  %s68_s12 = smov 124  }
   0x2   :  { %5 = vst [vmem:[#allocation0] sm:$0x3] %v4_v0  ;;  %s69_s13 = smov 123   ;;  %s70_s14 = smov 122  }
   0x3   :  { %s71_s15 = smov 121  }
   0x9   :  { %v9_v1 = vld [vmem:[#allocation0] sm:$0x3]  }
   0xa   :  { %v21_v2 = vld [vmem:[#allocation0] sm:$0x3]   ;;  %10 = vrot.lane.b32.xlu0 %v9_v1, %s65_s0 }
   0xb   :  { %22 = vrot.lane.b32.xlu1 %v21_v2, %s66_s8  ;;  %v15_v3 = vld [vmem:[#allocation0] sm:$0x3]  }
   0xc   :  { %v27_v4 = vld [vmem:[#allocation0] sm:$0x3]  }
   0xd   :  { %v6_v5 = vld [vmem:[#allocation0] sm:$0x3]  }
   0xe   :  { %8 = vst.msk [vmem:[%s118_s1] ss:$8 sm:$0x3] %vm7_vm0, %v6_v5   ;;  %16 = vrot.lane.b32.xlu0 %v15_v3, %s67_s11  ;;  %v33_v6 = vld [vmem:[#allocation0] sm:$0x3]  }
   0xf   :  { %28 = vrot.lane.b32.xlu1 %v27_v4, %s68_s12  ;;  %v39_v7 = vld [vmem:[#allocation0] sm:$0x3]  }
  0x10   :  { %v45_v8 = vld [vmem:[#allocation0] sm:$0x3]  }
  0x12   :  { %34 = vrot.lane.b32.xlu0 %v33_v6, %s69_s13 }
  0x13   :  { %40 = vrot.lane.b32.xlu1 %v39_v7, %s70_s14 }
  0x16   :  { %46 = vrot.lane.b32.xlu0 %v45_v8, %s71_s15 }
  0x7c   :  { %v11_v9 = vpop.permute.xlu0 %10  }
  0x7d   :  { %v23_v10 = vpop.permute.xlu1 %22   ;;  %51 = vst.msk [vmem:[%s118_s1 + $0x1] ss:$8 sm:$0x3] %vm7_vm0, %v11_v9  }
  0x7e   :  { %53 = vst.msk [vmem:[%s118_s1 + $0x3] ss:$8 sm:$0x3] %vm7_vm0, %v23_v10  }
  0x80   :  { %v17_v11 = vpop.permute.xlu0 %16  }
  0x81   :  { %v29_v12 = vpop.permute.xlu1 %28   ;;  %52 = vst.msk [vmem:[%s118_s1 + $0x2] ss:$8 sm:$0x3] %vm7_vm0, %v17_v11  }
  0x82   :  { %54 = vst.msk [vmem:[%s118_s1 + $0x4] ss:$8 sm:$0x3] %vm7_vm0, %v29_v12  }
  0x84   :  { %v35_v13 = vpop.permute.xlu0 %34  }
  0x85   :  { %v41_v14 = vpop.permute.xlu1 %40   ;;  %55 = vst.msk [vmem:[%s118_s1 + $0x5] ss:$8 sm:$0x3] %vm7_vm0, %v35_v13  }
  0x86   :  { %56 = vst.msk [vmem:[%s118_s1 + $0x6] ss:$8 sm:$0x3] %vm7_vm0, %v41_v14  }
  0x88   :  { %v47_v15 = vpop.permute.xlu0 %46  }
  0x89   :  { %57 = vst.msk [vmem:[%s118_s1 + $0x7] ss:$8 sm:$0x3] %vm7_vm0, %v47_v15  }

// kernel: single_conv_block.3
= control target key start
LH: loop header
LB: loop body
LE: loop exit
PB: predicated region body
PF: predicated region fallthrough
CT: control target
= control target key end

     0   :  { %v65_v0 = vmov 0   ;;  %s122_s2 = inlined_call_operand.vmem [shape: f32[16,1], index: 2, kind: input, shape index: {}]   ;;  %s123_s1 = inlined_call_operand.vmem [shape: f32[16,1], index: 1, kind: input, shape index: {}]   ;;  %s124_s0 = inlined_call_operand.vmem [shape: f32[16,256], index: 0, kind: input, shape index: {}, may-alias: {0,3}]   ;;  %s125_s3 = inlined_call_operand.vmem [shape: f32[16,256], index: 3, kind: output, shape index: {}, may-alias: {0,3}]  }
   0x1   :  { %64 = vset.pattern.permute.xlu1 %v65_v0  ;;  %63 = vset.pattern.permute.xlu0 %v65_v0  ;;  %v34_v1 = vld [vmem:[%s122_s2] sm:$0xff]  ;;  %v35_v3 = vld [vmem:[%s122_s2 + $0x8] sm:$0xff]  ;;  %v16_v11 = vld [vmem:[%s124_s0 + $0x10] sm:$0xff] }
   0x2   :  { %v18_v2 = vld [vmem:[%s123_s1] sm:$0xff]  ;;  %38 = vperm.xlu1 %64, %v34_v1   ;;  %v19_v4 = vld [vmem:[%s123_s1 + $0x8] sm:$0xff]  ;;  %v17_v12 = vld [vmem:[%s124_s0 + $0x18] sm:$0xff] }
   0x3   :  { %22 = vperm.xlu0 %63, %v18_v2   ;;  %v14_v5 = vld [vmem:[%s124_s0] sm:$0xff]  ;;  %v15_v6 = vld [vmem:[%s124_s0 + $0x8] sm:$0xff] }
   0x6   :  { %43 = vperm.xlu1 %64, %v35_v3  }
   0x7   :  { %27 = vperm.xlu0 %63, %v19_v4  }
  0x81   :  { %v39_v7 = vpop.permute.xlu1 %38 }
  0x82   :  { %v23_v8 = vpop.permute.xlu0 %22 }
  0x83   :  { %v30_v9 = vmul.f32 %v23_v8, %v14_v5  ;;  %v31_v10 = vmul.f32 %v23_v8, %v15_v6 }
  0x85   :  { %v46_v13 = vadd.f32 %v39_v7, %v30_v9  ;;  %v47_v14 = vadd.f32 %v39_v7, %v31_v10  ;;  %v44_v20 = vpop.permute.xlu1 %43 }
  0x86   :  { %v28_v15 = vpop.permute.xlu0 %27 }
  0x87   :  { %v50_v16 = vmax.f32 %v46_v13, 0.0  ;;  %v51_v17 = vmax.f32 %v47_v14, 0.0  ;;  %v32_v18 = vmul.f32 %v28_v15, %v16_v11  ;;  %v33_v19 = vmul.f32 %v28_v15, %v17_v12 }
  0x89   :  { %54 = vst [vmem:[%s125_s3] sm:$0xff] %v50_v16  ;;  %55 = vst [vmem:[%s125_s3 + $0x8] sm:$0xff] %v51_v17  ;;  %v48_v21 = vadd.f32 %v44_v20, %v32_v18  ;;  %v49_v22 = vadd.f32 %v44_v20, %v33_v19 }
  0x8b   :  { %v52_v23 = vmax.f32 %v48_v21, 0.0  ;;  %v53_v24 = vmax.f32 %v49_v22, 0.0 }
  0x8d   :  { %56 = vst [vmem:[%s125_s3 + $0x10] sm:$0xff] %v52_v23  ;;  %57 = vst [vmem:[%s125_s3 + $0x18] sm:$0xff] %v53_v24 }

// kernel: single_conv_block.2
= control target key start
LH: loop header
LB: loop body
LE: loop exit
PB: predicated region body
PF: predicated region fallthrough
CT: control target
= control target key end

     0   :  { %s2067_s15 = smov 0   ;;  %s2069_s16 = smov 0   ;;  %s2897_s0 = inlined_call_operand.vmem [shape: f32[2,18,18,4], index: 0, kind: input, shape index: {}]   ;;  %s2898_s1 = inlined_call_operand.vmem [shape: f32[8,36], index: 1, kind: input, shape index: {}]   ;;  %s2899_s2 = inlined_call_operand.vmem [shape: f32[2,8,256], index: 2, kind: output, shape index: {0}]   ;;  %s2900_s3 = inlined_call_operand.vmem [shape: f32[2,8,1], index: 3, kind: output, shape index: {1}]   ;;  %s2901_s4 = inlined_call_operand.vmem [shape: f32[2,8,1], index: 4, kind: output, shape index: {2}]  }
   0x1   :  { %s2071_s17 = smov 0   ;;  %s2073_s18 = smov 0  }
   0x2   :  { %s2075_s19 = smov 0  }
   0x3 LB: > { %s24_s20 = sadd.s32 1, %s2020_s17  ;;  %s27_s21 = sadd.s32 1, %s2024_s18  ;;  %s2028_s19 = sphi %s2075_s19, %s15_s19   ;;  %s2024_s18 = sphi %s2073_s18, %s2961_s18   ;;  %s2020_s17 = sphi %s2071_s17, %s2960_s17   ;;  %s2016_s16 = sphi %s2069_s16, %s2959_s16   ;;  %s2012_s15 = sphi %s2067_s15, %s2958_s15  }
   0x4   : > { %p25_p0 = scmp.ge.s32.totalorder %s24_s20, 2  ;;  %p1453_p1 = scmp.ge.s32.totalorder %s2028_s19, 1 }
   0x5   : > { %p181_p2 = scmp.lt.s32.totalorder %s2028_s19, 5 }
   0x6   : > { %s2963_s20 = smov (%p25_p0, %s24_s20), 0  ;;  %s2965_s21 = smov (!%p25_p0, %s27_s21), %s2024_s18 }
   0x7   : > { %p182_p3 = pnand %p1453_p1, %p181_p2  ;;  %p29_p4 = scmp.ge.s32.totalorder %s2965_s21, 2 }
   0x9   : > { %s2967_s21 = smov (%p29_p4, %s2965_s21), 0  ;;  %185 = sbr.rel (%p182_p3) target bundleno = 645 (0x285), region = 28 }
  0x10   : > { %p218_p5 = scmp.lt.s32.totalorder %s2016_s16, 1  ;;  %s1460_s22 = smul.u32 192, %s2012_s15  ;;  %vm290_vm0 = vcmask 1046528   ;;  %vm331_vm1 = vcmask 1045504   ;;  %vm1018_vm2 = vcmask 31744   ;;  %vm1035_vm3 = vcmask 64512  }
  0x11   : > { %s2030_s9 = smov 12   ;;  %s2031_s10 = smov 4   ;;  %vm1052_vm4 = vcmask 97280   ;;  %vm1069_vm5 = vcmask 130048   ;;  %vm2039_vm6 = vmmov 0   ;;  %vm1086_vm7 = vcmask 162816  }
  0x12   : > { %s2969_s16 = smov (!%p218_p5, %s2016_s16), 1  ;;  %s2032_s11 = smov 24   ;;  %vm1103_vm8 = vcmask 195584   ;;  %vm1120_vm9 = vcmask 228352   ;;  %vm1137_vm10 = vcmask 261120   ;;  %vm1155_vm11 = vcmask 293888  }
  0x13   : > { %s1617_s23 = smul.u32 432, %s2969_s16  ;;  %s1457_s24 = sshll.u32 %s2969_s16, 3  ;;  %vm2712_vm12 = vmpackc.low %vm1155_vm11, %vm1155_vm11 }
  0x14   : > { %s2107_s27 = scalar_lea.vmem %s2900_s3, %s1457_s24  ;;  %s2112_s30 = scalar_lea.vmem %s2901_s4, %s1457_s24 }
  0x15   : > { %s222_s7 = scalar_lea.vmem %s2897_s0, %s1617_s23  ;;  %s2033_s12 = smov 8  }
  0x16   : > { %s2117_s8 = scalar_lea.vmem %s222_s7, %s1460_s22  ;;  %s2034_s13 = smov 16  }
  0x17   : > { %v2120_v0 = vld [vmem:[%s2117_s8 + $0x18] sm:$0xff]  ;;  %v2123_v1 = vld [vmem:[%s2117_s8 + $0x20] sm:$0xff]  ;;  %v2134_v7 = vld [vmem:[%s2117_s8 + $0x8] sm:$0xff]  ;;  %s2035_s14 = smov 20   ;;  %s2036_s22 = smov 32  }
  0x18   : > { %2913 = vst [vmem:[#allocation2_spill] sm:$0xff] %v2120_v0  ;;  %2914 = vst [vmem:[#allocation3_spill] sm:$0xff] %v2123_v1  ;;  %v2126_v2 = vld [vmem:[%s2117_s8] sm:$0xff]  ;;  %v424_v3 = vrot.slane %v2123_v1, 1  ;;  %v464_v4 = vrot.slane %v2123_v1, 2  ;;  %v1670_v5 = vpack.i.bf16 %v2123_v1, %v2120_v0  ;;  %v423_v6 = vrot.slane %v2120_v0, 1 }
  0x19   : > { %2915 = vst [vmem:[#allocation4_spill] sm:$0xff] %v2126_v2  ;;  %2916 = vst [vmem:[#allocation5_spill] sm:$0xff] %v2134_v7  ;;  %v244_v8 = vld [vmem:[%s2117_s8 + $0x10] sm:$0x3]  ;;  %v463_v9 = vrot.slane %v2120_v0, 2  ;;  %v291_v10 = vrot.slane %v2126_v2, 1 }
  0x1a   : > { %v292_v11 = vrot.slane %v2134_v7, 1  ;;  %v294_v12 = vrot.slane %v244_v8, 1  ;;  %v2141_v13 = vld [vmem:[%s2117_s8 + $0x30] sm:$0xff]  ;;  %v2144_v14 = vld [vmem:[%s2117_s8 + $0x38] sm:$0xff]  ;;  %1671 = vrot.lane.b32.xlu1 %v1670_v5, %s2030_s9  ;;  %v335_v15 = vrot.slane %v244_v8, 2  ;;  %v332_v26 = vrot.slane %v2126_v2, 2 }
  0x1b   : > { %2917 = vst [vmem:[#allocation6_spill] sm:$0xff] %v2141_v13  ;;  %2918 = vst [vmem:[#allocation7_spill] sm:$0xff] %v2144_v14  ;;  %v2148_v16 = vrot.slane %v2144_v14, 2  ;;  %v2152_v17 = vpack.i.bf16 %v2144_v14, %v2141_v13  ;;  %v1465_v18 = vld [vmem:[%s2117_s8 + $0x28] sm:$0x3]  ;;  %v2158_v21 = vrot.slane %v2144_v14, 1  ;;  %v2166_v28 = vsel %vm290_vm0, %v423_v6, %v424_v3 }
  0x1c   : > { %v293_v19 = vsel %vm290_vm0, %v291_v10, %v292_v11  ;;  %v295_v20 = vsel %vm290_vm0, %v292_v11, %v294_v12  ;;  %v594_v22 = vrot.slane %v2141_v13, 2  ;;  %v1491_v23 = vld [vmem:[%s2117_s8 + $0x40] sm:$0x3]  ;;  %v554_v25 = vrot.slane %v2141_v13, 1  ;;  %v247_v36 = vld [vmem:[%s2117_s8 + $0x28] sm:$0x3] }
  0x1d   : > { %v1680_v24 = vpack.i.bf16 %v295_v20, %v293_v19  ;;  %v333_v27 = vrot.slane %v2134_v7, 2  ;;  %v426_v29 = vrot.slane %v1465_v18, 1  ;;  %v465_v30 = vsel %vm331_vm1, %v463_v9, %v464_v4  ;;  %v1468_v42 = vld [vmem:[%s2117_s8 + $0x40] sm:$0x3]  ;;  %v2197_v53 = vld [vmem:[%s2117_s8 + $0x50] sm:$0xff]  ;;  %v2203_v56 = vld [vmem:[%s2117_s8 + $0x48] sm:$0xff] }
  0x1e   : > { %v466_v31 = vrot.slane %v1465_v18, 2  ;;  %1676 = vrot.lane.b32.xlu1 %v2152_v17, %s2032_s11  ;;  %v557_v34 = vrot.slane %v1491_v23, 1  ;;  %v2176_v35 = vsel %vm331_vm1, %v594_v22, %v2148_v16  ;;  %v597_v40 = vrot.slane %v1491_v23, 2  ;;  %2919 = vst [vmem:[#allocation8_spill] sm:$0xff] %v2197_v53  ;;  %2920 = vst [vmem:[#allocation9_spill] sm:$0xff] %v2203_v56  ;;  %s2037_s23 = smov 28  }
  0x1f   : > { %1681 = vrot.lane.b32.xlu0 %v1680_v24, %s2031_s10  ;;  %v334_v32 = vsel %vm331_vm1, %v332_v26, %v333_v27  ;;  %v336_v33 = vsel %vm331_vm1, %v333_v27, %v335_v15  ;;  %v427_v38 = vsel %vm290_vm0, %v424_v3, %v426_v29  ;;  %v299_v44 = vrot.slane %v247_v36, 1  ;;  %v1494_v57 = vld [vmem:[%s2117_s8 + $0x58] sm:$0x3]  ;;  %v250_v59 = vld [vmem:[%s2117_s8 + $0x40] sm:$0x3]  ;;  %v2232_v19 = vld [vmem:[%s2117_s8 + $0x68] sm:$0xff] }
  0x20   : > { %v1685_v37 = vpack.i.bf16 %v336_v33, %v334_v32  ;;  %v467_v39 = vsel %vm331_vm1, %v464_v4, %v466_v31  ;;  %v1690_v41 = vpack.i.bf16 %v427_v38, %v2166_v28  ;;  %v598_v43 = vsel %vm331_vm1, %v2148_v16, %v597_v40  ;;  %v1471_v11 = vld [vmem:[%s2117_s8 + $0x58] sm:$0x3]  ;;  %v2229_v18 = vld [vmem:[%s2117_s8 + $0x60] sm:$0xff]  ;;  %2922 = vst [vmem:[#allocation11_spill] sm:$0xff] %v2232_v19  ;;  %v1477_v38 = vld [vmem:[%s2117_s8 + $0x88] sm:$0x3] }
  0x21   : > { %v340_v45 = vrot.slane %v247_v36, 2  ;;  %v1695_v46 = vpack.i.bf16 %v467_v39, %v465_v30  ;;  %v1705_v47 = vpack.i.bf16 %v598_v43, %v2176_v35  ;;  %v2190_v48 = vsel %vm290_vm0, %v554_v25, %v2158_v21  ;;  %2921 = vst [vmem:[#allocation10_spill] sm:$0xff] %v2229_v18  ;;  %v1497_v25 = vld [vmem:[%s2117_s8 + $0x70] sm:$0x3]  ;;  %v2490_v13 = vld [vmem:[%s2117_s8 + $0xe0] sm:$0xff]  ;;  %v2493_v14 = vld [vmem:[%s2117_s8 + $0x78] sm:$0xff] }
  0x22   : > { %1691 = vrot.lane.b32.xlu1 %v1690_v41, %s2034_s13  ;;  %v558_v49 = vsel %vm290_vm0, %v2158_v21, %v557_v34  ;;  %v431_v51 = vrot.slane %v1468_v42, 1  ;;  %v300_v52 = vsel %vm290_vm0, %v424_v3, %v299_v44  ;;  %v471_v61 = vrot.slane %v1468_v42, 2  ;;  %v253_v34 = vld [vmem:[%s2117_s8 + $0x58] sm:$0x3]  ;;  %v2275_v42 = vld [vmem:[%s2117_s8 + $0x80] sm:$0xff]  ;;  %2925 = vst [vmem:[#allocation12_spill] sm:$0xff] %v2490_v13 }
  0x23   : > { %1686 = vrot.lane.b32.xlu0 %v1685_v37, %s2033_s12  ;;  %v341_v50 = vsel %vm331_vm1, %v464_v4, %v340_v45  ;;  %v1700_v54 = vpack.i.bf16 %v558_v49, %v2190_v48  ;;  %v1710_v60 = vpack.i.bf16 %v300_v52, %v2166_v28  ;;  %v2211_v62 = vrot.slane %v2197_v53, 1  ;;  %v256_v7 = vld [vmem:[%s2117_s8 + $0x70] sm:$0x3]  ;;  %p225_p6 = scmp.lt.s32.totalorder %s2012_s15, 1  ;;  %s1455_s28 = sshll.u32 %s2969_s16, 1 }
  0x24   : > { %v1715_v55 = vpack.i.bf16 %v341_v50, %v465_v30  ;;  %v432_v58 = vsel %vm290_vm0, %v2158_v21, %v431_v51  ;;  %v2214_v63 = vrot.slane %v2197_v53, 2  ;;  %v559_v3 = vrot.slane %v2203_v56, 1  ;;  %v2301_v51 = vld [vmem:[%s2117_s8 + $0x98] sm:$0xff]  ;;  %p1530_p7 = scmp.ne.s32.totalorder %s2012_s15, 0 }
  0x25   : > { %v599_v4 = vrot.slane %v2203_v56, 2  ;;  %v562_v5 = vrot.slane %v1494_v57, 1  ;;  %v1725_v6 = vpack.i.bf16 %v432_v58, %v2190_v48  ;;  %v602_v8 = vrot.slane %v1494_v57, 2  ;;  %s226_s26 = scalar_select %p225_p6, %s2012_s15, 1 }
  0x26   : > { %1706 = vrot.lane.b32.xlu1 %v1705_v47, %s2036_s22  ;;  %v304_v9 = vrot.slane %v250_v59, 1  ;;  %v345_v10 = vrot.slane %v250_v59, 2  ;;  %v472_v12 = vsel %vm331_vm1, %v2148_v16, %v471_v61  ;;  %v2226_v15 = vpack.i.bf16 %v2197_v53, %v2203_v56 }
  0x27   : > { %1696 = vrot.lane.b32.xlu0 %v1695_v46, %s2035_s14  ;;  %v2236_v20 = vsel %vm290_vm0, %v559_v3, %v2211_v62  ;;  %v2240_v22 = vsel %vm290_vm0, %v2211_v62, %v562_v5  ;;  %v2244_v23 = vsel %vm331_vm1, %v599_v4, %v2214_v63  ;;  %v436_v24 = vrot.slane %v1471_v11, 1  ;;  %v2327_v3 = vld [vmem:[%s2117_s8 + $0x90] sm:$0xff]  ;;  %v1503_v4 = vld [vmem:[%s2117_s8 + $0xa0] sm:$0x3]  ;;  %s228_s29 = sadd.s32 %s1455_s28, %s226_s26 }
  0x28   : > { %v603_v26 = vsel %vm331_vm1, %v2214_v63, %v602_v8  ;;  %v2253_v27 = vsel %vm290_vm0, %v2158_v21, %v304_v9  ;;  %v346_v28 = vsel %vm331_vm1, %v2148_v16, %v345_v10  ;;  %v476_v29 = vrot.slane %v1471_v11, 2  ;;  %v259_v10 = vld [vmem:[%s2117_s8 + $0x88] sm:$0x3]  ;;  %v1480_v11 = vld [vmem:[%s2117_s8 + $0xa0] sm:$0x3]  ;;  %s1456_s5 = sshll.u32 %s228_s29, 3 }
  0x29   : > { %v2258_v30 = vrot.slane %v2232_v19, 1  ;;  %v2261_v31 = vrot.slane %v2232_v19, 2  ;;  %v564_v32 = vrot.slane %v2229_v18, 1  ;;  %v604_v33 = vrot.slane %v2229_v18, 2 }
  0x2a   : > { %1716 = vrot.lane.b32.xlu1 %v1715_v55, %s2033_s12  ;;  %v1730_v21 = vpack.i.bf16 %v472_v12, %v2176_v35  ;;  %v567_v36 = vrot.slane %v1497_v25, 1  ;;  %v607_v37 = vrot.slane %v1497_v25, 2  ;;  %v1740_v16 = vpack.i.bf16 %v2240_v22, %v2236_v20  ;;  %v2418_v12 = vld [vmem:[%s2117_s8 + $0xc8] sm:$0xff] }
  0x2b   : > { %1701 = vrot.lane.b32.xlu0 %v1700_v54, %s2037_s23  ;;  %v1745_v39 = vpack.i.bf16 %v603_v26, %v2244_v23  ;;  %v1750_v40 = vpack.i.bf16 %v2253_v27, %v2190_v48  ;;  %v1755_v41 = vpack.i.bf16 %v346_v28, %v2176_v35  ;;  %v2283_v43 = vsel %vm290_vm0, %v2211_v62, %v436_v24  ;;  %v2290_v35 = vld [vmem:[%s2117_s8 + $0x70] sm:$0x3] }
  0x2c   : > { %v2287_v44 = vsel %vm331_vm1, %v2214_v63, %v476_v29  ;;  %v309_v45 = vrot.slane %v253_v34, 1  ;;  %v350_v46 = vrot.slane %v253_v34, 2  ;;  %v2298_v47 = vsel %vm331_vm1, %v604_v33, %v2261_v31 }
  0x2d   : > { %v446_v49 = vrot.slane %v1477_v38, 1  ;;  %v486_v50 = vrot.slane %v1477_v38, 2  ;;  %v2305_v52 = vsel %vm290_vm0, %v2258_v30, %v567_v36  ;;  %v2309_v54 = vsel %vm331_vm1, %v2261_v31, %v607_v37  ;;  %v2359_v36 = vld [vmem:[%s2117_s8 + $0xb0] sm:$0xff] }
  0x2e   : > { %1726 = vrot.lane.b32.xlu1 %v1725_v6, %s2034_s13  ;;  %v2312_v55 = vrot.slane %v2275_v42, 1  ;;  %v2315_v57 = vrot.slane %v2275_v42, 2  ;;  %v1765_v58 = vpack.i.bf16 %v2283_v43, %v2236_v20  ;;  %v441_v61 = vrot.slane %v2290_v35, 1 }
  0x2f   : > { %1711 = vrot.lane.b32.xlu0 %v1710_v60, %s2031_s10  ;;  %v2323_v60 = vpack.i.bf16 %v2232_v19, %v2229_v18  ;;  %v2334_v5 = vsel %vm290_vm0, %v2211_v62, %v309_v45  ;;  %v575_v9 = vrot.slane %v2301_v51, 1  ;;  %v2353_v22 = vsel %vm331_vm1, %v2214_v63, %v350_v46  ;;  %v2387_v46 = vld [vmem:[%s2117_s8 + $0xa8] sm:$0xff]  ;;  %v2441_v62 = vld [vmem:[%s2117_s8 + $0xc0] sm:$0xff] }
  0x30   : > { %v2338_v6 = vsel %vm290_vm0, %v2312_v55, %v446_v49  ;;  %v2342_v8 = vsel %vm331_vm1, %v2315_v57, %v486_v50  ;;  %v615_v24 = vrot.slane %v2301_v51, 2  ;;  %v574_v25 = vrot.slane %v2327_v3, 1  ;;  %v1506_v49 = vld [vmem:[%s2117_s8 + $0xb8] sm:$0x3] }
  0x31   : > { %v614_v26 = vrot.slane %v2327_v3, 2  ;;  %v577_v28 = vrot.slane %v1503_v4, 1  ;;  %v617_v29 = vrot.slane %v1503_v4, 2  ;;  %v360_v33 = vrot.slane %v259_v10, 2 }
  0x32   : > { %1736 = vrot.lane.b32.xlu1 %v2226_v15, %s2032_s11  ;;  %v451_v34 = vrot.slane %v1480_v11, 1  ;;  %v2365_v37 = vsel %vm290_vm0, %v574_v25, %v575_v9  ;;  %v262_v25 = vld [vmem:[%s2117_s8 + $0xa0] sm:$0x3]  ;;  %v579_v43 = vrot.slane %v2387_v46, 1  ;;  %v582_v4 = vrot.slane %v1506_v49, 1 }
  0x33   : > { %1721 = vrot.lane.b32.xlu0 %v2152_v17, %s2030_s9  ;;  %v2294_v17 = vsel %vm290_vm0, %v564_v32, %v2258_v30  ;;  %v319_v32 = vrot.slane %v259_v10, 1  ;;  %v2368_v38 = vsel %vm290_vm0, %v575_v9, %v577_v28  ;;  %v2384_v45 = vsel %vm331_vm1, %v2315_v57, %v360_v33 }
  0x34   : > { %v2395_v10 = vsel %vm290_vm0, %v575_v9, %v451_v34  ;;  %v620_v33 = vrot.slane %v2359_v36, 2  ;;  %v324_v50 = vrot.slane %v262_v25, 1  ;;  %v365_v63 = vrot.slane %v262_v25, 2 }
  0x35   : > { %v584_v59 = vrot.slane %v2441_v62, 1  ;;  %v2923_v56 = vpack.i.bf16 %v2287_v44, %v2244_v23  ;;  %v630_v1 = vrot.slane %v2490_v13, 2  ;;  %vm1282_vm13 = vcmask (!%p1530_p7), 7168  }
  0x36   : > { %1746 = vrot.lane.b32.xlu1 %v1745_v39, %s2036_s22  ;;  %v2371_v39 = vsel %vm331_vm1, %v614_v26, %v615_v24  ;;  %v1483_v26 = vld [vmem:[%s2117_s8 + $0xb8] sm:$0x3]  ;;  %v2435_v34 = vsel %vm290_vm0, %v575_v9, %v324_v50  ;;  %v2924_v9 = vpack.i.bf16 %v2309_v54, %v2298_v47 }
  0x37   : > { %1731 = vrot.lane.b32.xlu0 %v1730_v21, %s2035_s14  ;;  %v491_v21 = vrot.slane %v1480_v11, 2  ;;  %v580_v11 = vrot.slane %v2359_v36, 1  ;;  %v456_v28 = vrot.slane %v1483_v26, 1  ;;  %v265_v50 = vld [vmem:[%s2117_s8 + $0xb8] sm:$0x3] }
  0x38   : > { %v370_v19 = vrot.slane %v265_v50, 2 }
  0x39   : > { %v2421_v48 = vsel %vm290_vm0, %v579_v43, %v580_v11  ;;  %v2424_v27 = vsel %vm290_vm0, %v580_v11, %v582_v4  ;;  %v2438_v43 = vsel %vm331_vm1, %v615_v24, %v365_v63  ;;  %v1509_v63 = vld [vmem:[%s2117_s8 + $0xd0] sm:$0x3] }
  0x3a   : > { %1756 = vrot.lane.b32.xlu1 %v1755_v41, %s2033_s12  ;;  %v2380_v41 = vsel %vm290_vm0, %v2312_v55, %v319_v32  ;;  %v2405_v32 = vsel %vm331_vm1, %v615_v24, %v491_v21  ;;  %v622_v21 = vrot.slane %v1506_v49, 2  ;;  %v1486_v49 = vld [vmem:[%s2117_s8 + $0xd0] sm:$0x3]  ;;  %v627_v18 = vrot.slane %v1509_v63, 2 }
  0x3b   : > { %1741 = vrot.lane.b32.xlu0 %v1740_v16, %s2037_s23  ;;  %v2376_v16 = vsel %vm331_vm1, %v615_v24, %v617_v29  ;;  %v619_v29 = vrot.slane %v2387_v46, 2  ;;  %v585_v24 = vrot.slane %v2418_v12, 1 }
  0x3c   : > { %v2432_v25 = vsel %vm331_vm1, %v620_v33, %v622_v21 }
  0x3d   : > { %v2484_v53 = vsel %vm290_vm0, %v584_v59, %v585_v24  ;;  %v2505_v59 = vsel %vm331_vm1, %v620_v33, %v370_v19 }
  0x3e   : > { %1766 = vrot.lane.b32.xlu1 %v1765_v58, %s2034_s13  ;;  %v496_v58 = vrot.slane %v1483_v26, 2  ;;  %v625_v26 = vrot.slane %v2418_v12, 2 }
  0x3f   : > { %1751 = vrot.lane.b32.xlu0 %v1750_v40, %s2031_s10  ;;  %v2427_v40 = vsel %vm331_vm1, %v619_v29, %v620_v33  ;;  %v2461_v29 = vsel %vm290_vm0, %v580_v11, %v456_v28  ;;  %v587_v28 = vrot.slane %v1509_v63, 1 }
  0x40   : > { %v2464_v21 = vsel %vm331_vm1, %v620_v33, %v496_v58  ;;  %v329_v58 = vrot.slane %v265_v50, 1  ;;  %v461_v50 = vrot.slane %v1486_v49, 1  ;;  %v2499_v44 = vsel %vm331_vm1, %v625_v26, %v627_v18 }
  0x41   : > { %v501_v33 = vrot.slane %v1486_v49, 2  ;;  %v609_v18 = vrot.slane %v2493_v14, 2 }
  0x42   : > { %1776 = vrot.lane.b32.xlu1 %v2323_v60, %s2032_s11  ;;  %v2502_v54 = vsel %vm290_vm0, %v580_v11, %v329_v58  ;;  %v1512_v11 = vld [vmem:[%s2117_s8 + $0xe8] sm:$0x3]  ;;  %v2521_v19 = vsel %vm290_vm0, %v585_v24, %v461_v50  ;;  %v590_v58 = vrot.slane %v2490_v13, 1 }
  0x43   : > { %1761 = vrot.lane.b32.xlu0 %v2226_v15, %s2030_s9  ;;  %v442_v15 = vsel %vm290_vm0, %v2258_v30, %v441_v61  ;;  %v624_v61 = vrot.slane %v2441_v62, 2  ;;  %v2539_v2 = vsel %vm331_vm1, %v625_v26, %v501_v33  ;;  %v2929_v33 = vpack.i.bf16 %v2334_v5, %v2236_v20 }
  0x44   : > { %v1805_v4 = vpack.i.bf16 %v442_v15, %v2294_v17  ;;  %v1500_v15 = vld [vmem:[%s2117_s8 + $0x88] sm:$0x3]  ;;  %v355_v5 = vrot.slane %v256_v7, 2 }
  0x45   : > { %v2487_v63 = vsel %vm331_vm1, %v624_v61, %v625_v26  ;;  %v2926_v61 = vpack.i.bf16 %v2305_v52, %v2294_v17  ;;  %v612_v0 = vrot.slane %v1500_v15, 2  ;;  %v592_v52 = vrot.slane %v1512_v11, 1 }
  0x46   : > { %1786 = vrot.lane.b32.xlu1 %v2924_v9, %s2036_s22  ;;  %v2508_v9 = vld [vmem:[%s2117_s8 + $0xd8] sm:$0xff]  ;;  %s230_s8 = scalar_lea.vmem %s2899_s2, %s1456_s5 }
  0x47   : > { %1771 = vrot.lane.b32.xlu0 %v2923_v56, %s2035_s14  ;;  %v2496_v56 = vsel %vm290_vm0, %v585_v24, %v587_v28  ;;  %v2927_v28 = vpack.i.bf16 %v2353_v22, %v2244_v23  ;;  %v589_v49 = vrot.slane %v2508_v9, 1  ;;  %v629_v50 = vrot.slane %v2508_v9, 2 }
  0x48   : > { %v1970_v23 = vpack.i.bf16 %v2539_v2, %v2487_v63  ;;  %v2928_v24 = vrot.slane %v2290_v35, 2  ;;  %v2555_v26 = vsel %vm290_vm0, %v590_v58, %v592_v52  ;;  %v569_v35 = vrot.slane %v2493_v14, 1 }
  0x49   : > { %v2545_v22 = vsel %vm290_vm0, %v589_v49, %v590_v58  ;;  %v1815_v49 = vpack.i.bf16 %v2275_v42, %v2493_v14  ;;  %v613_v20 = vsel %vm331_vm1, %v2315_v57, %v612_v0  ;;  %v356_v0 = vsel %vm331_vm1, %v2261_v31, %v355_v5 }
  0x4a   : > { %1796 = vrot.lane.b32.xlu1 %v2927_v28, %s2033_s12  ;;  %v2548_v28 = vsel %vm331_vm1, %v629_v50, %v630_v1  ;;  %v482_v13 = vsel %vm331_vm1, %v2261_v31, %v2928_v24  ;;  %v1980_v24 = vpack.i.bf16 %v2555_v26, %v2545_v22  ;;  %v611_v50 = vsel %vm331_vm1, %v609_v18, %v2315_v57 }
  0x4b   : > { %1781 = vrot.lane.b32.xlu0 %v2926_v61, %s2037_s23  ;;  %v632_v61 = vrot.slane %v1512_v11, 2  ;;  %v1810_v52 = vpack.i.bf16 %v482_v13, %v2298_v47  ;;  %v1835_v13 = vpack.i.bf16 %v356_v0, %v2298_v47  ;;  %v1855_v31 = vpack.i.bf16 %v2301_v51, %v2327_v3 }
  0x4c   : > { %v1850_v47 = vpack.i.bf16 %v2342_v8, %v611_v50  ;;  %v2932_v8 = vpack.i.bf16 %v2395_v10, %v2365_v37  ;;  %v2936_v10 = vpack.i.bf16 %v2438_v43, %v2371_v39  ;;  %v2944_v43 = vpack.i.bf16 %v2521_v19, %v2484_v53 }
  0x4d   : > { %v2558_v11 = vsel %vm331_vm1, %v630_v1, %v632_v61  ;;  %v572_v1 = vrot.slane %v1500_v15, 1  ;;  %v1825_v61 = vpack.i.bf16 %v613_v20, %v611_v50  ;;  %v571_v15 = vsel %vm290_vm0, %v569_v35, %v2312_v55 }
  0x4e   : > { %1806 = vrot.lane.b32.xlu1 %v1805_v4, %s2034_s13  ;;  %v1985_v58 = vpack.i.bf16 %v2558_v11, %v2548_v28  ;;  %v2038_v4 = vmov 0.0|0.0  }
  0x4f   : > { %1791 = vrot.lane.b32.xlu0 %v2929_v33, %s2031_s10  ;;  %1585 = vmatprep.subr.bf16.mxu0 %v2038_v4  ;;  %v573_v18 = vsel %vm290_vm0, %v2312_v55, %v572_v1  ;;  %v314_v33 = vrot.slane %v256_v7, 1  ;;  %v1845_v7 = vpack.i.bf16 %v2338_v6, %v571_v15  ;;  %v2931_v55 = vpack.i.bf16 %v2368_v38, %v2365_v37 }
  0x50   : > { %v1820_v57 = vpack.i.bf16 %v573_v18, %v571_v15  ;;  %v1870_v6 = vpack.i.bf16 %v2380_v41, %v571_v15  ;;  %v2933_v38 = vpack.i.bf16 %v2405_v32, %v2371_v39  ;;  %v2934_v41 = vpack.i.bf16 %v2432_v25, %v2427_v40  ;;  %v2947_v15 = vld [vmem:[#allocation4_spill] sm:$0xff] }
  0x51   : > { %v2937_v32 = vpack.i.bf16 %v2435_v34, %v2365_v37  ;;  %v2938_v25 = vpack.i.bf16 %v2461_v29, %v2421_v48  ;;  %v2940_v37 = vpack.i.bf16 %v2499_v44, %v2487_v63  ;;  %v2941_v34 = vpack.i.bf16 %v2496_v56, %v2484_v53  ;;  %v2945_v29 = vld [vmem:[#allocation12_spill] sm:$0xff] }
  0x52   : > { %1816 = vrot.lane.b32.xlu1 %v1815_v49, %s2032_s11  ;;  %v2040_v53 = vmov 0.0  }
  0x53   : > { %1801 = vrot.lane.b32.xlu0 %v2323_v60, %s2030_s9  ;;  %v315_v60 = vsel %vm290_vm0, %v2258_v30, %v314_v33  ;;  %v2930_v30 = vpack.i.bf16 %v2376_v16, %v2371_v39  ;;  %v1895_v16 = vpack.i.bf16 %v2359_v36, %v2387_v46  ;;  %v2939_v39 = vpack.i.bf16 %v2464_v21, %v2427_v40 }
  0x54   : > { %v1830_v35 = vpack.i.bf16 %v315_v60, %v2294_v17  ;;  %v1875_v17 = vpack.i.bf16 %v2384_v45, %v611_v50  ;;  %v2935_v45 = vpack.i.bf16 %v2424_v27, %v2421_v48  ;;  %v2943_v27 = vpack.i.bf16 %v2502_v54, %v2421_v48  ;;  %1582 = vmatprep.mubr.msk.f32.mxu0 %vm2039_vm6, %v2040_v53 }
  0x55   : > { %v1975_v21 = vpack.i.bf16 %v2945_v29, %v2508_v9 }
  0x56   : > { %1826 = vrot.lane.b32.xlu1 %v1825_v61, %s2036_s22 }
  0x57   : > { %1811 = vrot.lane.b32.xlu0 %v1810_v52, %s2035_s14  ;;  %v2946_v52 = vld [vmem:[#allocation5_spill] sm:$0xff] }
  0x5a   : > { %1836 = vrot.lane.b32.xlu1 %v1835_v13, %s2033_s12 }
  0x5b   : > { %1821 = vrot.lane.b32.xlu0 %v1820_v57, %s2037_s23 }
  0x5e   : > { %1846 = vrot.lane.b32.xlu1 %v1845_v7, %s2034_s13 }
  0x5f   : > { %1831 = vrot.lane.b32.xlu0 %v1830_v35, %s2031_s10 }
  0x62   : > { %1856 = vrot.lane.b32.xlu1 %v1855_v31, %s2032_s11 }
  0x63   : > { %1841 = vrot.lane.b32.xlu0 %v1815_v49, %s2030_s9  ;;  %v1935_v49 = vpack.i.bf16 %v2418_v12, %v2441_v62  ;;  %v2942_v12 = vpack.i.bf16 %v2505_v59, %v2427_v40 }
  0x66   : > { %1866 = vrot.lane.b32.xlu1 %v2930_v30, %s2036_s22 }
  0x67   : > { %1851 = vrot.lane.b32.xlu0 %v1850_v47, %s2035_s14 }
  0x6a   : > { %1876 = vrot.lane.b32.xlu1 %v1875_v17, %s2033_s12 }
  0x6b   : > { %1861 = vrot.lane.b32.xlu0 %v2931_v55, %s2037_s23 }
  0x6e   : > { %1886 = vrot.lane.b32.xlu1 %v2932_v8, %s2034_s13 }
  0x6f   : > { %1871 = vrot.lane.b32.xlu0 %v1870_v6, %s2031_s10 }
  0x72   : > { %1896 = vrot.lane.b32.xlu1 %v1895_v16, %s2032_s11 }
  0x73   : > { %1881 = vrot.lane.b32.xlu0 %v1855_v31, %s2030_s9 }
  0x76   : > { %1906 = vrot.lane.b32.xlu1 %v2934_v41, %s2036_s22 }
  0x77   : > { %1891 = vrot.lane.b32.xlu0 %v2933_v38, %s2035_s14 }
  0x7a   : > { %1916 = vrot.lane.b32.xlu1 %v2936_v10, %s2033_s12  ;;  %v2041_v10 = vmov (!%p1530_p7), 0.0  }
  0x7b   : > { %1901 = vrot.lane.b32.xlu0 %v2935_v45, %s2037_s23  ;;  %1283 = vst.msk [vmem:[%s2107_s27] sm:$0xff] (!%p1530_p7), %vm1282_vm13, %v2041_v10  ;;  %1284 = vst.msk [vmem:[%s2112_s30] sm:$0xff] (!%p1530_p7), %vm1282_vm13, %v2041_v10 }
  0x7e   : > { %1926 = vrot.lane.b32.xlu1 %v2938_v25, %s2034_s13 }
  0x7f   : > { %1911 = vrot.lane.b32.xlu0 %v2937_v32, %s2031_s10 }
  0x82   : > { %1936 = vrot.lane.b32.xlu1 %v1935_v49, %s2032_s11 }
  0x83   : > { %1921 = vrot.lane.b32.xlu0 %v1895_v16, %s2030_s9 }
  0x86   : > { %1946 = vrot.lane.b32.xlu1 %v2940_v37, %s2036_s22 }
  0x87   : > { %1931 = vrot.lane.b32.xlu0 %v2939_v39, %s2035_s14 }
  0x8a   : > { %1956 = vrot.lane.b32.xlu1 %v2942_v12, %s2033_s12  ;;  %v2950_v12 = vld [vmem:[#allocation3_spill] sm:$0xff] }
  0x8b   : > { %1941 = vrot.lane.b32.xlu0 %v2941_v34, %s2037_s23 }
  0x8c   : > { %v1672_v62 = vpop.permute.xlu1 %1671 }
  0x8d   : > { %v1674_v20 = vunpack.i.h.bf16 %v1672_v62  ;;  %v1673_v5 = vunpack.i.l.bf16 %v1672_v62 }
  0x8e   : > { %1966 = vrot.lane.b32.xlu1 %v2944_v43, %s2034_s13 }
  0x8f   : > { %1951 = vrot.lane.b32.xlu0 %v2943_v27, %s2031_s10  ;;  %v2951_v27 = vld [vmem:[#allocation2_spill] sm:$0xff] }
  0x90   : > { %v1677_v44 = vpop.permute.xlu1 %1676 }
  0x91   : > { %v1682_v56 = vpop.permute.xlu0 %1681  ;;  %v1678_v31 = vunpack.i.l.bf16 %v1677_v44 }
  0x92   : > { %v1684_v1 = vunpack.i.h.bf16 %v1682_v56  ;;  %v1683_v50 = vunpack.i.l.bf16 %v1682_v56  ;;  %1976 = vrot.lane.b32.xlu1 %v1975_v21, %s2032_s11 }
  0x93   : > { %1961 = vrot.lane.b32.xlu0 %v1935_v49, %s2030_s9 }
  0x94   : > { %v1692_v40 = vpop.permute.xlu1 %1691  ;;  %v1020_v61 = vsel %vm1018_vm2, %v2946_v52, %v1684_v1  ;;  %v1019_v18 = vsel %vm1018_vm2, %v2947_v15, %v1683_v50 }
  0x95   : > { %v1687_v48 = vpop.permute.xlu0 %1686  ;;  %v1694_v9 = vunpack.i.h.bf16 %v1692_v40  ;;  %v1693_v19 = vunpack.i.l.bf16 %v1692_v40 }
  0x96   : > { %v1689_v54 = vunpack.i.h.bf16 %v1687_v48  ;;  %v1688_v59 = vunpack.i.l.bf16 %v1687_v48  ;;  %1986 = vrot.lane.b32.xlu1 %v1985_v58, %s2036_s22  ;;  %v1679_v58 = vunpack.i.h.bf16 %v1677_v44 }
  0x97   : > { %1971 = vrot.lane.b32.xlu0 %v1970_v23, %s2035_s14 }
  0x98   : > { %v1036_v33 = vsel %vm1035_vm3, %v1019_v18, %v1688_v59  ;;  %v1037_v0 = vsel %vm1035_vm3, %v1020_v61, %v1689_v54  ;;  %v1707_v35 = vpop.permute.xlu1 %1706 }
  0x99   : > { %v1053_v57 = vsel %vm1052_vm4, %v1036_v33, %v1673_v5  ;;  %v1054_v13 = vsel %vm1052_vm4, %v1037_v0, %v1674_v20  ;;  %v1697_v60 = vpop.permute.xlu0 %1696  ;;  %v1709_v30 = vunpack.i.h.bf16 %v1707_v35  ;;  %v1708_v17 = vunpack.i.l.bf16 %v1707_v35 }
  0x9a   : > { %v1070_v7 = vsel %vm1069_vm5, %v1053_v57, %v1693_v19  ;;  %v1071_v2 = vsel %vm1069_vm5, %v1054_v13, %v1694_v9  ;;  %v1699_v63 = vunpack.i.h.bf16 %v1697_v60  ;;  %v1698_v23 = vunpack.i.l.bf16 %v1697_v60 }
  0x9b   : > { %1981 = vrot.lane.b32.xlu0 %v1980_v24, %s2037_s23 }
  0x9c   : > { %v1087_v28 = vsel %vm1086_vm7, %v1070_v7, %v1698_v23  ;;  %v1088_v11 = vsel %vm1086_vm7, %v1071_v2, %v1699_v63  ;;  %v1717_v55 = vpop.permute.xlu1 %1716 }
  0x9d   : > { %v1702_v47 = vpop.permute.xlu0 %1701  ;;  %v1104_v16 = vsel %vm1103_vm8, %v1087_v28, %v1678_v31  ;;  %v1105_v22 = vsel %vm1103_vm8, %v1088_v11, %v1679_v58  ;;  %v1719_v37 = vunpack.i.h.bf16 %v1717_v55  ;;  %v1718_v34 = vunpack.i.l.bf16 %v1717_v55 }
  0x9e   : > { %v1704_v6 = vunpack.i.h.bf16 %v1702_v47  ;;  %v1703_v8 = vunpack.i.l.bf16 %v1702_v47 }
  0xa0   : > { %v1121_v26 = vsel %vm1120_vm9, %v1104_v16, %v1703_v8  ;;  %v1122_v24 = vsel %vm1120_vm9, %v1105_v22, %v1704_v6  ;;  %v1727_v32 = vpop.permute.xlu1 %1726  ;;  %v2952_v16 = vld [vmem:[#allocation7_spill] sm:$0xff] }
  0xa1   : > { %v1712_v38 = vpop.permute.xlu0 %1711  ;;  %v1138_v41 = vsel %vm1137_vm10, %v1121_v26, %v1708_v17  ;;  %v1139_v45 = vsel %vm1137_vm10, %v1122_v24, %v1709_v30  ;;  %v1729_v48 = vunpack.i.h.bf16 %v1727_v32  ;;  %v1728_v40 = vunpack.i.l.bf16 %v1727_v32  ;;  %v2953_v26 = vld [vmem:[#allocation6_spill] sm:$0xff] }
  0xa2   : > { %v1714_v25 = vunpack.i.h.bf16 %v1712_v38  ;;  %v1713_v49 = vunpack.i.l.bf16 %v1712_v38  ;;  %v1586_v39 = vpack.c.bf16 %v1139_v45, %v1138_v41 }
  0xa4   : > { %v1022_v62 = vsel %vm1018_vm2, %v2950_v12, %v1714_v25  ;;  %v1021_v43 = vsel %vm1018_vm2, %v2951_v27, %v1713_v49  ;;  %1588 = vmatpush3.bf16.xpose.msk.msra.mxu0 %vm2712_vm12, %v1586_v39  ;;  %v1737_v21 = vpop.permute.xlu1 %1736 }
  0xa5   : > { %v1722_v29 = vpop.permute.xlu0 %1721  ;;  %1589 = vmatprep.subr.bf16.mxu0 %v2038_v4  ;;  %v1038_v1 = vsel %vm1035_vm3, %v1021_v43, %v1718_v34  ;;  %v1039_v50 = vsel %vm1035_vm3, %v1022_v62, %v1719_v37  ;;  %v1739_v61 = vunpack.i.h.bf16 %v1737_v21  ;;  %v1738_v15 = vunpack.i.l.bf16 %v1737_v21 }
  0xa6   : > { %v1724_v56 = vunpack.i.h.bf16 %v1722_v29  ;;  %v1723_v44 = vunpack.i.l.bf16 %v1722_v29 }
  0xa8   : > { %v1055_v53 = vsel %vm1052_vm4, %v1038_v1, %v1723_v44  ;;  %v1056_v54 = vsel %vm1052_vm4, %v1039_v50, %v1724_v56  ;;  %v1747_v9 = vpop.permute.xlu1 %1746 }
  0xa9   : > { %v1732_v59 = vpop.permute.xlu0 %1731  ;;  %v1072_v5 = vsel %vm1069_vm5, %v1055_v53, %v1728_v40  ;;  %v1073_v52 = vsel %vm1069_vm5, %v1056_v54, %v1729_v48  ;;  %v1749_v57 = vunpack.i.h.bf16 %v1747_v9  ;;  %v1748_v13 = vunpack.i.l.bf16 %v1747_v9 }
  0xaa   : > { %v1734_v19 = vunpack.i.h.bf16 %v1732_v59  ;;  %v1733_v20 = vunpack.i.l.bf16 %v1732_v59 }
  0xac   : > { %v1089_v18 = vsel %vm1086_vm7, %v1072_v5, %v1733_v20  ;;  %v1090_v33 = vsel %vm1086_vm7, %v1073_v52, %v1734_v19  ;;  %v1757_v60 = vpop.permute.xlu1 %1756 }
  0xad   : > { %v1742_v0 = vpop.permute.xlu0 %1741  ;;  %v1106_v2 = vsel %vm1103_vm8, %v1089_v18, %v1738_v15  ;;  %v1107_v63 = vsel %vm1103_vm8, %v1090_v33, %v1739_v61  ;;  %v1759_v6 = vunpack.i.h.bf16 %v1757_v60  ;;  %v1758_v8 = vunpack.i.l.bf16 %v1757_v60 }
  0xae   : > { %v1744_v35 = vunpack.i.h.bf16 %v1742_v0  ;;  %v1743_v7 = vunpack.i.l.bf16 %v1742_v0 }
  0xb0   : > { %v1123_v23 = vsel %vm1120_vm9, %v1106_v2, %v1743_v7  ;;  %v1124_v28 = vsel %vm1120_vm9, %v1107_v63, %v1744_v35  ;;  %v1767_v47 = vpop.permute.xlu1 %1766  ;;  %v2954_v2 = vld [vmem:[#allocation8_spill] sm:$0xff] }
  0xb1   : > { %v1140_v11 = vsel %vm1137_vm10, %v1123_v23, %v1748_v13  ;;  %v1141_v58 = vsel %vm1137_vm10, %v1124_v28, %v1749_v57  ;;  %v1752_v31 = vpop.permute.xlu0 %1751  ;;  %v1769_v39 = vunpack.i.h.bf16 %v1767_v47  ;;  %v1768_v37 = vunpack.i.l.bf16 %v1767_v47  ;;  %v2955_v23 = vld [vmem:[#allocation9_spill] sm:$0xff] }
  0xb2   : > { %v1590_v30 = vpack.c.bf16 %v1141_v58, %v1140_v11  ;;  %v1754_v17 = vunpack.i.h.bf16 %v1752_v31  ;;  %v1753_v55 = vunpack.i.l.bf16 %v1752_v31 }
  0xb4   : > { %v1024_v22 = vsel %vm1018_vm2, %v2952_v16, %v1754_v17  ;;  %v1023_v24 = vsel %vm1018_vm2, %v2953_v26, %v1753_v55  ;;  %1592 = vmatpush3.bf16.xpose.msk.msra.mxu0 %vm2712_vm12, %v1590_v30  ;;  %v1777_v41 = vpop.permute.xlu1 %1776 }
  0xb5   : > { %v1762_v38 = vpop.permute.xlu0 %1761  ;;  %1593 = vmatprep.subr.bf16.mxu0 %v2038_v4  ;;  %v1040_v25 = vsel %vm1035_vm3, %v1023_v24, %v1758_v8  ;;  %v1041_v49 = vsel %vm1035_vm3, %v1024_v22, %v1759_v6  ;;  %v1779_v44 = vunpack.i.h.bf16 %v1777_v41  ;;  %v1778_v1 = vunpack.i.l.bf16 %v1777_v41 }
  0xb6   : > { %v1764_v45 = vunpack.i.h.bf16 %v1762_v38  ;;  %v1763_v32 = vunpack.i.l.bf16 %v1762_v38 }
  0xb8   : > { %v1057_v34 = vsel %vm1052_vm4, %v1040_v25, %v1763_v32  ;;  %v1058_v12 = vsel %vm1052_vm4, %v1041_v49, %v1764_v45  ;;  %v1787_v27 = vpop.permute.xlu1 %1786 }
  0xb9   : > { %v1772_v62 = vpop.permute.xlu0 %1771  ;;  %v1074_v21 = vsel %vm1069_vm5, %v1057_v34, %v1768_v37  ;;  %v1075_v56 = vsel %vm1069_vm5, %v1058_v12, %v1769_v39  ;;  %v1789_v53 = vunpack.i.h.bf16 %v1787_v27  ;;  %v1788_v54 = vunpack.i.l.bf16 %v1787_v27 }
  0xba   : > { %v1774_v43 = vunpack.i.h.bf16 %v1772_v62  ;;  %v1773_v29 = vunpack.i.l.bf16 %v1772_v62 }
  0xbc   : > { %v1091_v50 = vsel %vm1086_vm7, %v1074_v21, %v1773_v29  ;;  %v1092_v48 = vsel %vm1086_vm7, %v1075_v56, %v1774_v43  ;;  %v1797_v59 = vpop.permute.xlu1 %1796 }
  0xbd   : > { %v1782_v40 = vpop.permute.xlu0 %1781  ;;  %v1108_v20 = vsel %vm1103_vm8, %v1091_v50, %v1778_v1  ;;  %v1109_v5 = vsel %vm1103_vm8, %v1092_v48, %v1779_v44  ;;  %v1799_v35 = vunpack.i.h.bf16 %v1797_v59  ;;  %v1798_v7 = vunpack.i.l.bf16 %v1797_v59 }
  0xbe   : > { %v1784_v9 = vunpack.i.h.bf16 %v1782_v40  ;;  %v1783_v19 = vunpack.i.l.bf16 %v1782_v40 }
  0xc0   : > { %v1125_v52 = vsel %vm1120_vm9, %v1108_v20, %v1783_v19  ;;  %v1126_v61 = vsel %vm1120_vm9, %v1109_v5, %v1784_v9  ;;  %v1807_v0 = vpop.permute.xlu1 %1806  ;;  %v2956_v20 = vld [vmem:[#allocation11_spill] sm:$0xff] }
  0xc1   : > { %v1142_v15 = vsel %vm1137_vm10, %v1125_v52, %v1788_v54  ;;  %v1143_v18 = vsel %vm1137_vm10, %v1126_v61, %v1789_v53  ;;  %v1792_v33 = vpop.permute.xlu0 %1791  ;;  %v1809_v55 = vunpack.i.h.bf16 %v1807_v0  ;;  %v1808_v6 = vunpack.i.l.bf16 %v1807_v0  ;;  %v2957_v52 = vld [vmem:[#allocation10_spill] sm:$0xff] }
  0xc2   : > { %v1594_v57 = vpack.c.bf16 %v1143_v18, %v1142_v15  ;;  %v1794_v13 = vunpack.i.h.bf16 %v1792_v33  ;;  %v1793_v60 = vunpack.i.l.bf16 %v1792_v33 }
  0xc4   : > { %v1026_v63 = vsel %vm1018_vm2, %v2954_v2, %v1794_v13  ;;  %v1025_v28 = vsel %vm1018_vm2, %v2955_v23, %v1793_v60  ;;  %1596 = vmatpush3.bf16.xpose.msk.msra.mxu0 %vm2712_vm12, %v1594_v57  ;;  %v1817_v58 = vpop.permute.xlu1 %1816 }
  0xc5   : > { %v1802_v11 = vpop.permute.xlu0 %1801  ;;  %1597 = vmatprep.subr.bf16.mxu0 %v2038_v4  ;;  %v1042_v30 = vsel %vm1035_vm3, %v1025_v28, %v1798_v7  ;;  %v1043_v17 = vsel %vm1035_vm3, %v1026_v63, %v1799_v35  ;;  %v1819_v32 = vunpack.i.h.bf16 %v1817_v58  ;;  %v1818_v25 = vunpack.i.l.bf16 %v1817_v58 }
  0xc6   : > { %v1804_v31 = vunpack.i.h.bf16 %v1802_v11  ;;  %v1803_v47 = vunpack.i.l.bf16 %v1802_v11 }
  0xc8   : > { %v1059_v8 = vsel %vm1052_vm4, %v1042_v30, %v1803_v47  ;;  %v1060_v16 = vsel %vm1052_vm4, %v1043_v17, %v1804_v31  ;;  %v1827_v26 = vpop.permute.xlu1 %1826 }
  0xc9   : > { %v1812_v22 = vpop.permute.xlu0 %1811  ;;  %v1076_v41 = vsel %vm1069_vm5, %v1059_v8, %v1808_v6  ;;  %v1077_v45 = vsel %vm1069_vm5, %v1060_v16, %v1809_v55  ;;  %v1829_v34 = vunpack.i.h.bf16 %v1827_v26  ;;  %v1828_v12 = vunpack.i.l.bf16 %v1827_v26 }
  0xca   : > { %v1814_v24 = vunpack.i.h.bf16 %v1812_v22  ;;  %v1813_v38 = vunpack.i.l.bf16 %v1812_v22 }
  0xcc   : > { %v1093_v49 = vsel %vm1086_vm7, %v1076_v41, %v1813_v38  ;;  %v1094_v39 = vsel %vm1086_vm7, %v1077_v45, %v1814_v24  ;;  %v1837_v62 = vpop.permute.xlu1 %1836 }
  0xcd   : > { %v1822_v37 = vpop.permute.xlu0 %1821  ;;  %v1110_v29 = vsel %vm1103_vm8, %v1093_v49, %v1818_v25  ;;  %v1111_v21 = vsel %vm1103_vm8, %v1094_v39, %v1819_v32  ;;  %v1839_v9 = vunpack.i.h.bf16 %v1837_v62  ;;  %v1838_v19 = vunpack.i.l.bf16 %v1837_v62 }
  0xce   : > { %v1824_v27 = vunpack.i.h.bf16 %v1822_v37  ;;  %v1823_v43 = vunpack.i.l.bf16 %v1822_v37 }
  0xd0   : > { %v1127_v56 = vsel %vm1120_vm9, %v1110_v29, %v1823_v43  ;;  %v1128_v44 = vsel %vm1120_vm9, %v1111_v21, %v1824_v27  ;;  %v1847_v40 = vpop.permute.xlu1 %1846 }
  0xd1   : > { %v1144_v1 = vsel %vm1137_vm10, %v1127_v56, %v1828_v12  ;;  %v1145_v50 = vsel %vm1137_vm10, %v1128_v44, %v1829_v34  ;;  %v1832_v48 = vpop.permute.xlu0 %1831  ;;  %v1849_v60 = vunpack.i.h.bf16 %v1847_v40  ;;  %v1848_v35 = vunpack.i.l.bf16 %v1847_v40 }
  0xd2   : > { %v1598_v53 = vpack.c.bf16 %v1145_v50, %v1144_v1  ;;  %v1834_v54 = vunpack.i.h.bf16 %v1832_v48  ;;  %v1833_v59 = vunpack.i.l.bf16 %v1832_v48 }
  0xd4   : > { %v1028_v5 = vsel %vm1018_vm2, %v2956_v20, %v1834_v54  ;;  %v1027_v61 = vsel %vm1018_vm2, %v2957_v52, %v1833_v59  ;;  %1600 = vmatpush3.bf16.xpose.msk.msra.mxu0 %vm2712_vm12, %v1598_v53  ;;  %v1857_v18 = vpop.permute.xlu1 %1856 }
  0xd5   : > { %v1842_v15 = vpop.permute.xlu0 %1841  ;;  %1601 = vmatprep.subr.bf16.mxu0 %v2038_v4  ;;  %v1044_v57 = vsel %vm1035_vm3, %v1027_v61, %v1838_v19  ;;  %v1045_v13 = vsel %vm1035_vm3, %v1028_v5, %v1839_v9  ;;  %v1859_v47 = vunpack.i.h.bf16 %v1857_v18  ;;  %v1858_v30 = vunpack.i.l.bf16 %v1857_v18 }
  0xd6   : > { %v1844_v33 = vunpack.i.h.bf16 %v1842_v15  ;;  %v1843_v0 = vunpack.i.l.bf16 %v1842_v15 }
  0xd8   : > { %v1061_v7 = vsel %vm1052_vm4, %v1044_v57, %v1843_v0  ;;  %v1062_v2 = vsel %vm1052_vm4, %v1045_v13, %v1844_v33  ;;  %v1867_v23 = vpop.permute.xlu1 %1866 }
  0xd9   : > { %v1852_v63 = vpop.permute.xlu0 %1851  ;;  %v1078_v58 = vsel %vm1069_vm5, %v1061_v7, %v1848_v35  ;;  %v1079_v31 = vsel %vm1069_vm5, %v1062_v2, %v1849_v60  ;;  %v1869_v8 = vunpack.i.h.bf16 %v1867_v23  ;;  %v1868_v16 = vunpack.i.l.bf16 %v1867_v23 }
  0xda   : > { %v1854_v28 = vunpack.i.h.bf16 %v1852_v63  ;;  %v1853_v11 = vunpack.i.l.bf16 %v1852_v63 }
  0xdc   : > { %v1095_v17 = vsel %vm1086_vm7, %v1078_v58, %v1853_v11  ;;  %v1096_v55 = vsel %vm1086_vm7, %v1079_v31, %v1854_v28  ;;  %v1877_v22 = vpop.permute.xlu1 %1876 }
  0xdd   : > { %v1862_v6 = vpop.permute.xlu0 %1861  ;;  %v1112_v38 = vsel %vm1103_vm8, %v1095_v17, %v1858_v30  ;;  %v1113_v41 = vsel %vm1103_vm8, %v1096_v55, %v1859_v47  ;;  %v1879_v27 = vunpack.i.h.bf16 %v1877_v22  ;;  %v1878_v43 = vunpack.i.l.bf16 %v1877_v22 }
  0xde   : > { %v1864_v26 = vunpack.i.h.bf16 %v1862_v6  ;;  %v1863_v24 = vunpack.i.l.bf16 %v1862_v6 }
  0xe0   : > { %v1129_v45 = vsel %vm1120_vm9, %v1112_v38, %v1863_v24  ;;  %v1130_v32 = vsel %vm1120_vm9, %v1113_v41, %v1864_v26  ;;  %v1887_v37 = vpop.permute.xlu1 %1886 }
  0xe1   : > { %v1146_v25 = vsel %vm1137_vm10, %v1129_v45, %v1868_v16  ;;  %v1147_v49 = vsel %vm1137_vm10, %v1130_v32, %v1869_v8  ;;  %v1872_v39 = vpop.permute.xlu0 %1871  ;;  %v1889_v53 = vunpack.i.h.bf16 %v1887_v37  ;;  %v1888_v54 = vunpack.i.l.bf16 %v1887_v37 }
  0xe2   : > { %v1602_v34 = vpack.c.bf16 %v1147_v49, %v1146_v25  ;;  %v1874_v12 = vunpack.i.h.bf16 %v1872_v39  ;;  %v1873_v62 = vunpack.i.l.bf16 %v1872_v39 }
  0xe4   : > { %v1030_v29 = vsel %vm1018_vm2, %v2275_v42, %v1874_v12  ;;  %v1029_v21 = vsel %vm1018_vm2, %v2493_v14, %v1873_v62  ;;  %1604 = vmatpush3.bf16.xpose.msk.msra.mxu0 %vm2712_vm12, %v1602_v34  ;;  %v1897_v44 = vpop.permute.xlu1 %1896 }
  0xe5   : > { %v1882_v56 = vpop.permute.xlu0 %1881  ;;  %1605 = vmatprep.subr.bf16.mxu0 %v2038_v4  ;;  %v1046_v48 = vsel %vm1035_vm3, %v1029_v21, %v1878_v43  ;;  %v1047_v40 = vsel %vm1035_vm3, %v1030_v29, %v1879_v27  ;;  %v1899_v61 = vunpack.i.h.bf16 %v1897_v44  ;;  %v1898_v15 = vunpack.i.l.bf16 %v1897_v44 }
  0xe6   : > { %v1884_v1 = vunpack.i.h.bf16 %v1882_v56  ;;  %v1883_v50 = vunpack.i.l.bf16 %v1882_v56 }
  0xe8   : > { %v1063_v42 = vsel %vm1052_vm4, %v1046_v48, %v1883_v50  ;;  %v1064_v59 = vsel %vm1052_vm4, %v1047_v40, %v1884_v1  ;;  %v1907_v9 = vpop.permute.xlu1 %1906 }
  0xe9   : > { %v1892_v14 = vpop.permute.xlu0 %1891  ;;  %v1080_v5 = vsel %vm1069_vm5, %v1063_v42, %v1888_v54  ;;  %v1081_v52 = vsel %vm1069_vm5, %v1064_v59, %v1889_v53  ;;  %v1909_v57 = vunpack.i.h.bf16 %v1907_v9  ;;  %v1908_v13 = vunpack.i.l.bf16 %v1907_v9 }
  0xea   : > { %v1894_v19 = vunpack.i.h.bf16 %v1892_v14  ;;  %v1893_v20 = vunpack.i.l.bf16 %v1892_v14 }
  0xec   : > { %v1097_v18 = vsel %vm1086_vm7, %v1080_v5, %v1893_v20  ;;  %v1098_v33 = vsel %vm1086_vm7, %v1081_v52, %v1894_v19  ;;  %v1917_v60 = vpop.permute.xlu1 %1916 }
  0xed   : > { %v1902_v0 = vpop.permute.xlu0 %1901  ;;  %v1114_v2 = vsel %vm1103_vm8, %v1097_v18, %v1898_v15  ;;  %v1115_v63 = vsel %vm1103_vm8, %v1098_v33, %v1899_v61  ;;  %v1919_v6 = vunpack.i.h.bf16 %v1917_v60  ;;  %v1918_v8 = vunpack.i.l.bf16 %v1917_v60 }
  0xee   : > { %v1904_v35 = vunpack.i.h.bf16 %v1902_v0  ;;  %v1903_v7 = vunpack.i.l.bf16 %v1902_v0 }
  0xf0   : > { %v1131_v23 = vsel %vm1120_vm9, %v1114_v2, %v1903_v7  ;;  %v1132_v28 = vsel %vm1120_vm9, %v1115_v63, %v1904_v35  ;;  %v1927_v47 = vpop.permute.xlu1 %1926 }
  0xf1   : > { %v1148_v11 = vsel %vm1137_vm10, %v1131_v23, %v1908_v13  ;;  %v1149_v58 = vsel %vm1137_vm10, %v1132_v28, %v1909_v57  ;;  %v1912_v31 = vpop.permute.xlu0 %1911  ;;  %v1929_v25 = vunpack.i.h.bf16 %v1927_v47  ;;  %v1928_v49 = vunpack.i.l.bf16 %v1927_v47 }
  0xf2   : > { %v1606_v30 = vpack.c.bf16 %v1149_v58, %v1148_v11  ;;  %v1914_v17 = vunpack.i.h.bf16 %v1912_v31  ;;  %v1913_v55 = vunpack.i.l.bf16 %v1912_v31 }
  0xf4   : > { %v1032_v16 = vsel %vm1018_vm2, %v2301_v51, %v1914_v17  ;;  %v1031_v22 = vsel %vm1018_vm2, %v2327_v3, %v1913_v55  ;;  %1608 = vmatpush3.bf16.xpose.msk.msra.mxu0 %vm2712_vm12, %v1606_v30  ;;  %v1937_v24 = vpop.permute.xlu1 %1936 }
  0xf5   : > { %v1922_v26 = vpop.permute.xlu0 %1921  ;;  %1609 = vmatprep.subr.bf16.mxu0 %v2038_v4  ;;  %v1048_v45 = vsel %vm1035_vm3, %v1031_v22, %v1918_v8  ;;  %v1049_v32 = vsel %vm1035_vm3, %v1032_v16, %v1919_v6  ;;  %v1939_v43 = vunpack.i.h.bf16 %v1937_v24  ;;  %v1938_v29 = vunpack.i.l.bf16 %v1937_v24 }
  0xf6   : > { %v1924_v38 = vunpack.i.h.bf16 %v1922_v26  ;;  %v1923_v41 = vunpack.i.l.bf16 %v1922_v26 }
  0xf8   : > { %v1065_v51 = vsel %vm1052_vm4, %v1048_v45, %v1923_v41  ;;  %v1066_v39 = vsel %vm1052_vm4, %v1049_v32, %v1924_v38  ;;  %v1947_v37 = vpop.permute.xlu1 %1946 }
  0xf9   : > { %v1932_v3 = vpop.permute.xlu0 %1931  ;;  %v1082_v62 = vsel %vm1069_vm5, %v1065_v51, %v1928_v49  ;;  %v1083_v27 = vsel %vm1069_vm5, %v1066_v39, %v1929_v25  ;;  %v1949_v1 = vunpack.i.h.bf16 %v1947_v37  ;;  %v1948_v50 = vunpack.i.l.bf16 %v1947_v37 }
  0xfa   : > { %v1934_v34 = vunpack.i.h.bf16 %v1932_v3  ;;  %v1933_v12 = vunpack.i.l.bf16 %v1932_v3  ;;  %v1154_v3 = vld [vmem:[%s2898_s1] sm:$0xff] }
  0xfc   : > { %v1099_v21 = vsel %vm1086_vm7, %v1082_v62, %v1933_v12  ;;  %v1100_v56 = vsel %vm1086_vm7, %v1083_v27, %v1934_v34  ;;  %v1957_v48 = vpop.permute.xlu1 %1956 }
  0xfd   : > { %v1942_v44 = vpop.permute.xlu0 %1941  ;;  %v1116_v54 = vsel %vm1103_vm8, %v1099_v21, %v1938_v29  ;;  %v1117_v42 = vsel %vm1103_vm8, %v1100_v56, %v1939_v43  ;;  %v1959_v18 = vunpack.i.h.bf16 %v1957_v48  ;;  %v1958_v33 = vunpack.i.l.bf16 %v1957_v48 }
  0xfe   : > { %v1944_v40 = vunpack.i.h.bf16 %v1942_v44  ;;  %v1943_v53 = vunpack.i.l.bf16 %v1942_v44 }
 0x100   : > { %v1133_v59 = vsel %vm1120_vm9, %v1116_v54, %v1943_v53  ;;  %v1134_v14 = vsel %vm1120_vm9, %v1117_v42, %v1944_v40  ;;  %v1967_v5 = vpop.permute.xlu1 %1966 }
 0x101   : > { %v1150_v9 = vsel %vm1137_vm10, %v1133_v59, %v1948_v50  ;;  %v1151_v19 = vsel %vm1137_vm10, %v1134_v14, %v1949_v1  ;;  %v1952_v20 = vpop.permute.xlu0 %1951  ;;  %v1969_v23 = vunpack.i.h.bf16 %v1967_v5  ;;  %v1968_v28 = vunpack.i.l.bf16 %v1967_v5 }
 0x102   : > { %v1610_v52 = vpack.c.bf16 %v1151_v19, %v1150_v9  ;;  %v1954_v61 = vunpack.i.h.bf16 %v1952_v20  ;;  %v1953_v15 = vunpack.i.l.bf16 %v1952_v20 }
 0x104   : > { %v1034_v0 = vsel %vm1018_vm2, %v2359_v36, %v1954_v61  ;;  %v1033_v57 = vsel %vm1018_vm2, %v2387_v46, %v1953_v15  ;;  %1612 = vmatpush3.bf16.xpose.msk.msra.mxu0 %vm2712_vm12, %v1610_v52  ;;  %v1977_v60 = vpop.permute.xlu1 %1976 }
 0x105   : > { %v1962_v13 = vpop.permute.xlu0 %1961  ;;  %1613 = vmatprep.subr.bf16.mxu0 %v2038_v4  ;;  %v1050_v2 = vsel %vm1035_vm3, %v1033_v57, %v1958_v33  ;;  %v1051_v63 = vsel %vm1035_vm3, %v1034_v0, %v1959_v18  ;;  %v1979_v17 = vunpack.i.h.bf16 %v1977_v60  ;;  %v1978_v55 = vunpack.i.l.bf16 %v1977_v60 }
 0x106   : > { %v1964_v35 = vunpack.i.h.bf16 %v1962_v13  ;;  %v1963_v7 = vunpack.i.l.bf16 %v1962_v13 }
 0x108   : > { %v1067_v36 = vsel %vm1052_vm4, %v1050_v2, %v1963_v7  ;;  %v1068_v11 = vsel %vm1052_vm4, %v1051_v63, %v1964_v35  ;;  %v1987_v47 = vpop.permute.xlu1 %1986 }
 0x109   : > { %v1972_v46 = vpop.permute.xlu0 %1971  ;;  %v1084_v30 = vsel %vm1069_vm5, %v1067_v36, %v1968_v28  ;;  %v1085_v4 = vsel %vm1069_vm5, %v1068_v11, %v1969_v23  ;;  %v1989_v22 = vunpack.i.h.bf16 %v1987_v47  ;;  %v1988_v26 = vunpack.i.l.bf16 %v1987_v47 }
 0x10a   : > { %v1974_v58 = vunpack.i.h.bf16 %v1972_v46  ;;  %v1973_v31 = vunpack.i.l.bf16 %v1972_v46 }
 0x10c   : > { %v1101_v6 = vsel %vm1086_vm7, %v1084_v30, %v1973_v31  ;;  %v1102_v8 = vsel %vm1086_vm7, %v1085_v4, %v1974_v58 }
 0x10d   : > { %v1982_v16 = vpop.permute.xlu0 %1981  ;;  %v1118_v41 = vsel %vm1103_vm8, %v1101_v6, %v1978_v55  ;;  %v1119_v45 = vsel %vm1103_vm8, %v1102_v8, %v1979_v17 }
 0x10e   : > { %v1984_v24 = vunpack.i.h.bf16 %v1982_v16  ;;  %v1983_v38 = vunpack.i.l.bf16 %v1982_v16 }
 0x110   : > { %v1135_v32 = vsel %vm1120_vm9, %v1118_v41, %v1983_v38  ;;  %v1136_v25 = vsel %vm1120_vm9, %v1119_v45, %v1984_v24 }
 0x111   : > { %v1152_v49 = vsel %vm1137_vm10, %v1135_v32, %v1988_v26  ;;  %v1153_v51 = vsel %vm1137_vm10, %v1136_v25, %v1989_v22 }
 0x112   : > { %v1614_v39 = vpack.c.bf16 %v1153_v51, %v1152_v49 }
 0x114   : > { %1616 = vmatpush3.bf16.xpose.msk.msra.mxu0 %vm2712_vm12, %v1614_v39 }
 0x11b   : > { %1583 = vmatmul.mubr.msk.f32.vlgmr.msra.gmra.mrb[0].mxu0 %vm1155_vm11, %v1154_v3 }
 0x1e9   : > { %1281 = sbr.rel (%p1530_p7) target bundleno = 496 (0x1f0), region = 32 }
 0x1ee   : > { %v1273_v37 = vpop.f32.mrb[0].mxu0 }
 0x1ef   : > { %1277 = vst [vmem:[%s230_s8] sm:$0xff] %v1273_v37  ;;  %v1584_v34 = vpop.f32.mrb[1].mxu0 }
 0x1f0 PF: > { %1286 = vadd.xlane.f32.xlu0 %v1273_v37  ;;  %v1292_v12 = vmul.f32 %v1273_v37, %v1273_v37  ;;  %v1285_v62 = vld [vmem:[%s2107_s27] sm:$0xff]  ;;  %vm1289_vm14 = vcmask 7168  }
 0x1f1   : > { %v1291_v29 = vld [vmem:[%s2112_s30] sm:$0xff] }
 0x1f4   : > { %1293 = vadd.xlane.f32.xlu0 %v1292_v12 }
 0x27d   : > { %v1287_v27 = vpop.xlane.xlu0 %1286 }
 0x27e   : > { %v1288_v43 = vadd.f32 %v1287_v27, %v1285_v62 }
 0x280   : > { %1290 = vst.msk [vmem:[%s2107_s27] sm:$0xff] %vm1289_vm14, %v1288_v43 }
 0x281   : > { %v1294_v21 = vpop.xlane.xlu0 %1293 }
 0x282   : > { %v1295_v56 = vadd.f32 %v1294_v21, %v1291_v29 }
 0x284   : > { %1296 = vst.msk [vmem:[%s2112_s30] sm:$0xff] %vm1289_vm14, %v1295_v56 }
 0x285 PF: > { %s15_s19 = sadd.s32 1, %s2028_s19   ;;  %s2958_s15 = smov %s2020_s17 }
 0x286   : > { %p12_p8 = scmp.ge.s32.totalorder %s15_s19, 6   ;;  %s2959_s16 = smov %s2024_s18 }
 0x287   : > { %s2960_s17 = smov %s2963_s20  ;;  %s2961_s18 = smov %s2967_s21 }
 0x288   :  { %14 = sbr.rel (!%p12_p8) target bundleno = 3 (0x3), region = 89 }

</bundles_post_ra>
